<compile_context>
chip_gen: v6e
topology: v6e:2x2x1
jax: 0.10.0
libtpu: 0.0.40
codegen_flags: <defaults>
</compile_context>

<pallas_src>
import jax
import jax.numpy as jnp
from jax.experimental import pallas as pl
from jax.experimental.pallas import tpu as pltpu

# ---- module hyper-parameters (GNNCritic.__init__ defaults) --------------------
STATE_NDIM = 4
ACTION_NDIM = 2
N_TAPS = 4            # TAGConv filter taps (K)
N_LAYERS = 2          # graph conv layers
N_CHANNELS = 32       # hidden channels
NEG_SLOPE = 0.01      # leaky_relu

# ---- padded (TPU-friendly) sizes ----------------------------------------------
N_PAD = 32            # nodes (real = 16), sublane-aligned, headroom
F_PAD = 128           # input features (real = STATE_NDIM + ACTION_NDIM)
C_PAD = 128           # hidden channels (real = 32), lane-dense
O_PAD = 128           # output channels (real = 1), lane-dense output
G_PAD = 8             # graphs in batch (real = 2)


def _leaky_relu(v):
    return jnp.where(v >= 0, v, NEG_SLOPE * v)


def gnn_critic_kernel(x_ref, a_pows_ref, scat_ref,
                      w_in_ref, b_in_ref,
                      w_tap_ref, b_tap_ref,
                      w_out_ref, b_out_ref,
                      out_ref):
    f32 = jnp.float32
    bf16 = jnp.bfloat16

    # read-in MLP (mlp_read_layers=1 -> single Linear, no activation)
    x = x_ref[0]                                                 # [N_PAD, F_PAD] bf16
    h = jnp.dot(x, w_in_ref[...], preferred_element_type=f32) + b_in_ref[...]

    # TAGConv layers: z = sum_{k=0..K} (A^k h) W_k + b ; activation = leaky_relu
    for layer in range(N_LAYERS):
        hb = h.astype(bf16)
        # independent bf16 propagation taps (A^k precomputed in f32 outside,
        # cast to bf16 once) -- all 4 depend only on h, MXU can stream them.
        taps = [hb]
        for k in range(N_TAPS):
            taps.append(
                jnp.dot(a_pows_ref[k], hb, preferred_element_type=f32).astype(bf16))
        # accumulate tap contributions directly into one f32 tile
        z = b_tap_ref[layer]                                     # [1, C_PAD] f32
        for k in range(N_TAPS + 1):
            z = z + jnp.dot(taps[k], w_tap_ref[layer * (N_TAPS + 1) + k],
                            preferred_element_type=f32)
        h = _leaky_relu(z)         # mlp_per_gnn_layers=0 -> no extra MLP

    # read-out reordered: (S @ h) @ W_out + b_out.  Exact for real rows (each
    # real S row sums to 1); padded rows hold b_out and are sliced off later.
    g = jnp.dot(scat_ref[...], h.astype(bf16), preferred_element_type=f32)
    out_ref[0] = jnp.dot(g.astype(bf16), w_out_ref[...],
                         preferred_element_type=f32) + b_out_ref[...]


def _const_spec(shape):
    n = len(shape)
    return pl.BlockSpec(shape, lambda t: (0,) * n)


@jax.jit
def gnn_critic_pallas(x_p, a_pows, scat_p, w_in, b_in, w_tap, b_tap, w_out, b_out):
    T = x_p.shape[0]
    in_specs = [
        pl.BlockSpec((1, N_PAD, F_PAD), lambda t: (t, 0, 0)),    # per-step x
        _const_spec(a_pows.shape),                               # A^1..A^4 (resident)
        _const_spec(scat_p.shape),
        _const_spec(w_in.shape),
        _const_spec(b_in.shape),
        _const_spec(w_tap.shape),
        _const_spec(b_tap.shape),
        _const_spec(w_out.shape),
        _const_spec(b_out.shape),
    ]
    return pl.pallas_call(
        gnn_critic_kernel,
        out_shape=jax.ShapeDtypeStruct((T, G_PAD, O_PAD), jnp.float32),
        grid=(T,),
        in_specs=in_specs,
        out_specs=pl.BlockSpec((1, G_PAD, O_PAD), lambda t: (t, 0, 0)),
        compiler_params=pltpu.CompilerParams(
            dimension_semantics=("parallel",)),                  # v7x: 2 TCs share steps
    )(x_p, a_pows, scat_p, w_in, b_in, w_tap, b_tap, w_out, b_out)


if __name__ == "__main__":
    T = 4             # timesteps batched over the grid (same graph each step)
    N = 16            # nodes
    G = 2             # graphs in the batch (8 nodes each)
    F_IN = STATE_NDIM + ACTION_NDIM
    bf16 = jnp.bfloat16

    key = jax.random.PRNGKey(0)
    ks = jax.random.split(key, 9)

    # ---- inputs ---------------------------------------------------------------
    state = jax.random.normal(ks[0], (T, N, STATE_NDIM), jnp.float32)
    action = jax.random.normal(ks[1], (T, N, ACTION_NDIM), jnp.float32)
    x = jnp.concatenate([state, action], axis=-1)                # [T, N, F_IN]

    # graph: two disjoint bidirectional rings of 8 nodes; data.batch = graph id
    batch = jnp.concatenate([jnp.zeros(8, jnp.int32), jnp.ones(8, jnp.int32)])
    srcs, dsts = [], []
    for g in range(G):
        base = g * 8
        for i in range(8):
            a, b = base + i, base + (i + 1) % 8
            srcs += [a, b]
            dsts += [b, a]
    src = jnp.array(srcs, jnp.int32)
    dst = jnp.array(dsts, jnp.int32)
    E = int(src.shape[0])
    edge_attr = jax.random.uniform(ks[2], (E,), jnp.float32, 0.5, 1.5)

    # symmetric-normalized weighted adjacency (TAGConv norm), A[dst, src]
    deg = jnp.zeros((N,), jnp.float32).at[src].add(edge_attr)
    dinv = jnp.where(deg > 0, 1.0 / jnp.sqrt(deg), 0.0)
    norm = dinv[src] * edge_attr * dinv[dst]
    A = jnp.zeros((N, N), jnp.float32).at[dst, src].add(norm)

    # scatter_mean matrix: S[g, n] = 1/|g| if batch[n] == g else 0
    counts = jnp.zeros((G,), jnp.float32).at[batch].add(1.0)
    counts = jnp.maximum(counts, 1.0)                            # guard empty graphs
    S = jax.nn.one_hot(batch, G, dtype=jnp.float32).T / counts[:, None]   # [G, N]

    # ---- deterministic synthetic parameters ------------------------------------
    sc = 0.1
    w_in_r = sc * jax.random.normal(ks[3], (F_IN, N_CHANNELS), jnp.float32)
    b_in_r = sc * jax.random.normal(ks[4], (N_CHANNELS,), jnp.float32)
    w_tap_r = sc * jax.random.normal(
        ks[5], (N_LAYERS, N_TAPS + 1, N_CHANNELS, N_CHANNELS), jnp.float32)
    b_tap_r = sc * jax.random.normal(ks[6], (N_LAYERS, N_CHANNELS), jnp.float32)
    w_out_r = sc * jax.random.normal(ks[7], (N_CHANNELS, 1), jnp.float32)
    b_out_r = sc * jax.random.normal(ks[8], (1,), jnp.float32)

    # ---- zero-pad / cast everything to kernel shapes ----------------------------
    def pad_to(a, shape):
        out = jnp.zeros(shape, a.dtype)
        return out.at[tuple(slice(0, d) for d in a.shape)].set(a)

    x_p = pad_to(x, (T, N_PAD, F_PAD)).astype(bf16)
    A_p = pad_to(A, (N_PAD, N_PAD))                              # f32

    # adjacency power chain computed ONCE in f32 outside the kernel, cast to bf16
    A2 = jnp.dot(A_p, A_p, preferred_element_type=jnp.float32)
    A3 = jnp.dot(A2, A_p, preferred_element_type=jnp.float32)
    A4 = jnp.dot(A3, A_p, preferred_element_type=jnp.float32)
    a_pows = jnp.stack([A_p, A2, A3, A4]).astype(bf16)           # [4, N_PAD, N_PAD]

    S_p = pad_to(S, (G_PAD, N_PAD)).astype(bf16)                 # 1/8 exact in bf16
    w_in_p = pad_to(w_in_r, (F_PAD, C_PAD)).astype(bf16)
    b_in_p = pad_to(b_in_r[None, :], (1, C_PAD))                 # f32
    b_tap_p = pad_to(b_tap_r[:, None, :], (N_LAYERS, 1, C_PAD))  # f32
    w_out_p = pad_to(w_out_r, (C_PAD, O_PAD)).astype(bf16)
    b_out_p = pad_to(b_out_r[None, :], (1, O_PAD))               # f32

    # flattened per-tap weights: w_tap_p[layer*(K+1)+k] = W_k (bf16, zero-padded)
    w_tap_f32 = jnp.zeros((N_LAYERS * (N_TAPS + 1), C_PAD, C_PAD), jnp.float32)
    for layer in range(N_LAYERS):
        for k in range(N_TAPS + 1):
            w_tap_f32 = w_tap_f32.at[
                layer * (N_TAPS + 1) + k, :N_CHANNELS, :N_CHANNELS
            ].set(w_tap_r[layer, k])
    w_tap_p = w_tap_f32.astype(bf16)

    # ---- run kernel --------------------------------------------------------------
    out_pad = gnn_critic_pallas(x_p, a_pows, S_p, w_in_p, b_in_p,
                                w_tap_p, b_tap_p, w_out_p, b_out_p)
    out = out_pad[:, :G, :1]                                     # [T, G, 1]
    jax.block_until_ready(out)

    # ---- reference 1: mirrors kernel math exactly (same padded bf16 operands) ----
    def dotf(a, b):
        return jnp.dot(a, b, preferred_element_type=jnp.float32)

    def matched_step(x_t_pad):
        h = dotf(x_t_pad, w_in_p) + b_in_p
        for layer in range(N_LAYERS):
            hb = h.astype(bf16)
            taps = [hb]
            for k in range(N_TAPS):
                taps.append(dotf(a_pows[k], hb).astype(bf16))
            z = b_tap_p[layer]
            for k in range(N_TAPS + 1):
                z = z + dotf(taps[k], w_tap_p[layer * (N_TAPS + 1) + k])
            h = jnp.where(z >= 0, z, NEG_SLOPE * z)
        g = dotf(S_p, h.astype(bf16))
        return dotf(g.astype(bf16), w_out_p) + b_out_p

    ref_matched = jnp.stack([matched_step(x_p[t]) for t in range(T)])[:, :G, :1]

    # ---- reference 2: module-exact pure-f32 forward -------------------------------
    def module_step(x_t):
        h = x_t @ w_in_r + b_in_r
        for layer in range(N_LAYERS):
            p = h
            z = p @ w_tap_r[layer, 0]
            for k in range(1, N_TAPS + 1):
                p = A @ p
                z = z + p @ w_tap_r[layer, k]
            zb = z + b_tap_r[layer]
            h = jnp.where(zb >= 0, zb, NEG_SLOPE * zb)
        y = h @ w_out_r + b_out_r
        return S @ y                                             # scatter_mean(y, batch)

    ref_f32 = jnp.stack([module_step(x[t]) for t in range(T)])   # [T, G, 1]

    assert out.shape == (T, G, 1)
    assert jnp.allclose(out, ref_matched, atol=1e-3, rtol=1e-3)  # kernel structure exact
    assert jnp.allclose(out, ref_f32, atol=2e-2, rtol=2e-2)      # bf16 vs f32 module semantics
    print("KERNEL_OK")
</pallas_src>

<mosaic_0001>
module attributes {stable_mosaic.version = 11 : i64} {
  func.func @gnn_critic_kernel(%arg0: i32, %arg1: memref<1x32x128xbf16, #tpu.memory_space<vmem>>, %arg2: memref<4x32x32xbf16, #tpu.memory_space<vmem>>, %arg3: memref<8x32xbf16, #tpu.memory_space<vmem>>, %arg4: memref<128x128xbf16, #tpu.memory_space<vmem>>, %arg5: memref<1x128xf32, #tpu.memory_space<vmem>>, %arg6: memref<10x128x128xbf16, #tpu.memory_space<vmem>>, %arg7: memref<2x1x128xf32, #tpu.memory_space<vmem>>, %arg8: memref<128x128xbf16, #tpu.memory_space<vmem>>, %arg9: memref<1x128xf32, #tpu.memory_space<vmem>>, %arg10: memref<1x8x128xf32, #tpu.memory_space<vmem>>) attributes {dimension_semantics = [#tpu.dimension_semantics<parallel>], iteration_bounds = array<i64: 4>, scalar_prefetch = 0 : i64, scratch_operands = 0 : i64, tpu.core_type = #tpu.core_type<tc>, window_params = [{transform_indices = @transform_0, window_bounds = array<i64: 1, 32, 128>}, {pipeline_mode = #tpu.pipeline_mode<synchronous>, transform_indices = @transform_1, window_bounds = array<i64: 4, 32, 32>}, {pipeline_mode = #tpu.pipeline_mode<synchronous>, transform_indices = @transform_2, window_bounds = array<i64: 8, 32>}, {pipeline_mode = #tpu.pipeline_mode<synchronous>, transform_indices = @transform_3, window_bounds = array<i64: 128, 128>}, {pipeline_mode = #tpu.pipeline_mode<synchronous>, transform_indices = @transform_4, window_bounds = array<i64: 1, 128>}, {pipeline_mode = #tpu.pipeline_mode<synchronous>, transform_indices = @transform_5, window_bounds = array<i64: 10, 128, 128>}, {pipeline_mode = #tpu.pipeline_mode<synchronous>, transform_indices = @transform_6, window_bounds = array<i64: 2, 1, 128>}, {pipeline_mode = #tpu.pipeline_mode<synchronous>, transform_indices = @transform_7, window_bounds = array<i64: 128, 128>}, {pipeline_mode = #tpu.pipeline_mode<synchronous>, transform_indices = @transform_8, window_bounds = array<i64: 1, 128>}, {transform_indices = @transform_9, window_bounds = array<i64: 1, 8, 128>}]} {
    %c0 = arith.constant 0 : index
    %c0_0 = arith.constant 0 : index
    %c0_1 = arith.constant 0 : index
    %0 = vector.load %arg1[%c0, %c0_0, %c0_1] : memref<1x32x128xbf16, #tpu.memory_space<vmem>>, vector<1x32x128xbf16>
    %1 = vector.shape_cast %0 : vector<1x32x128xbf16> to vector<32x128xbf16>
    %c0_2 = arith.constant 0 : index
    %c0_3 = arith.constant 0 : index
    %2 = vector.load %arg4[%c0_2, %c0_3] : memref<128x128xbf16, #tpu.memory_space<vmem>>, vector<128x128xbf16>
    %cst = arith.constant dense<0.000000e+00> : vector<32x128xf32>
    %3 = tpu.matmul %1, %2, %cst {dimension_numbers = #tpu.dot_dimension_numbers<[1], [0], [0], [1], [0, 0, 1, 1], [], []>} : vector<32x128xbf16>, vector<128x128xbf16>, vector<32x128xf32> -> vector<32x128xf32>
    %c0_4 = arith.constant 0 : index
    %c0_5 = arith.constant 0 : index
    %4 = vector.load %arg5[%c0_4, %c0_5] : memref<1x128xf32, #tpu.memory_space<vmem>>, vector<1x128xf32>
    %5 = vector.broadcast %4 : vector<1x128xf32> to vector<32x128xf32>
    %6 = arith.addf %3, %5 : vector<32x128xf32>
    %7 = arith.truncf %6 : vector<32x128xf32> to vector<32x128xbf16>
    %c0_6 = arith.constant 0 : index
    %c0_7 = arith.constant 0 : index
    %c0_8 = arith.constant 0 : index
    %8 = vector.load %arg2[%c0_6, %c0_7, %c0_8] : memref<4x32x32xbf16, #tpu.memory_space<vmem>>, vector<1x32x32xbf16>
    %9 = vector.shape_cast %8 : vector<1x32x32xbf16> to vector<32x32xbf16>
    %cst_9 = arith.constant dense<0.000000e+00> : vector<32x128xf32>
    %10 = tpu.matmul %9, %7, %cst_9 {dimension_numbers = #tpu.dot_dimension_numbers<[1], [0], [0], [1], [0, 0, 1, 1], [], []>} : vector<32x32xbf16>, vector<32x128xbf16>, vector<32x128xf32> -> vector<32x128xf32>
    %11 = arith.truncf %10 : vector<32x128xf32> to vector<32x128xbf16>
    %c1 = arith.constant 1 : index
    %c0_10 = arith.constant 0 : index
    %c0_11 = arith.constant 0 : index
    %12 = vector.load %arg2[%c1, %c0_10, %c0_11] : memref<4x32x32xbf16, #tpu.memory_space<vmem>>, vector<1x32x32xbf16>
    %13 = vector.shape_cast %12 : vector<1x32x32xbf16> to vector<32x32xbf16>
    %cst_12 = arith.constant dense<0.000000e+00> : vector<32x128xf32>
    %14 = tpu.matmul %13, %7, %cst_12 {dimension_numbers = #tpu.dot_dimension_numbers<[1], [0], [0], [1], [0, 0, 1, 1], [], []>} : vector<32x32xbf16>, vector<32x128xbf16>, vector<32x128xf32> -> vector<32x128xf32>
    %15 = arith.truncf %14 : vector<32x128xf32> to vector<32x128xbf16>
    %c2 = arith.constant 2 : index
    %c0_13 = arith.constant 0 : index
    %c0_14 = arith.constant 0 : index
    %16 = vector.load %arg2[%c2, %c0_13, %c0_14] : memref<4x32x32xbf16, #tpu.memory_space<vmem>>, vector<1x32x32xbf16>
    %17 = vector.shape_cast %16 : vector<1x32x32xbf16> to vector<32x32xbf16>
    %cst_15 = arith.constant dense<0.000000e+00> : vector<32x128xf32>
    %18 = tpu.matmul %17, %7, %cst_15 {dimension_numbers = #tpu.dot_dimension_numbers<[1], [0], [0], [1], [0, 0, 1, 1], [], []>} : vector<32x32xbf16>, vector<32x128xbf16>, vector<32x128xf32> -> vector<32x128xf32>
    %19 = arith.truncf %18 : vector<32x128xf32> to vector<32x128xbf16>
    %c3 = arith.constant 3 : index
    %c0_16 = arith.constant 0 : index
    %c0_17 = arith.constant 0 : index
    %20 = vector.load %arg2[%c3, %c0_16, %c0_17] : memref<4x32x32xbf16, #tpu.memory_space<vmem>>, vector<1x32x32xbf16>
    %21 = vector.shape_cast %20 : vector<1x32x32xbf16> to vector<32x32xbf16>
    %cst_18 = arith.constant dense<0.000000e+00> : vector<32x128xf32>
    %22 = tpu.matmul %21, %7, %cst_18 {dimension_numbers = #tpu.dot_dimension_numbers<[1], [0], [0], [1], [0, 0, 1, 1], [], []>} : vector<32x32xbf16>, vector<32x128xbf16>, vector<32x128xf32> -> vector<32x128xf32>
    %23 = arith.truncf %22 : vector<32x128xf32> to vector<32x128xbf16>
    %c0_19 = arith.constant 0 : index
    %c0_20 = arith.constant 0 : index
    %c0_21 = arith.constant 0 : index
    %24 = vector.load %arg7[%c0_19, %c0_20, %c0_21] : memref<2x1x128xf32, #tpu.memory_space<vmem>>, vector<1x1x128xf32>
    %25 = vector.shape_cast %24 : vector<1x1x128xf32> to vector<1x128xf32>
    %c0_22 = arith.constant 0 : index
    %c0_23 = arith.constant 0 : index
    %c0_24 = arith.constant 0 : index
    %26 = vector.load %arg6[%c0_22, %c0_23, %c0_24] : memref<10x128x128xbf16, #tpu.memory_space<vmem>>, vector<1x128x128xbf16>
    %27 = vector.shape_cast %26 : vector<1x128x128xbf16> to vector<128x128xbf16>
    %cst_25 = arith.constant dense<0.000000e+00> : vector<32x128xf32>
    %28 = tpu.matmul %7, %27, %cst_25 {dimension_numbers = #tpu.dot_dimension_numbers<[1], [0], [0], [1], [0, 0, 1, 1], [], []>} : vector<32x128xbf16>, vector<128x128xbf16>, vector<32x128xf32> -> vector<32x128xf32>
    %29 = vector.broadcast %25 : vector<1x128xf32> to vector<32x128xf32>
    %30 = arith.addf %29, %28 : vector<32x128xf32>
    %c1_26 = arith.constant 1 : index
    %c0_27 = arith.constant 0 : index
    %c0_28 = arith.constant 0 : index
    %31 = vector.load %arg6[%c1_26, %c0_27, %c0_28] : memref<10x128x128xbf16, #tpu.memory_space<vmem>>, vector<1x128x128xbf16>
    %32 = vector.shape_cast %31 : vector<1x128x128xbf16> to vector<128x128xbf16>
    %cst_29 = arith.constant dense<0.000000e+00> : vector<32x128xf32>
    %33 = tpu.matmul %11, %32, %cst_29 {dimension_numbers = #tpu.dot_dimension_numbers<[1], [0], [0], [1], [0, 0, 1, 1], [], []>} : vector<32x128xbf16>, vector<128x128xbf16>, vector<32x128xf32> -> vector<32x128xf32>
    %34 = arith.addf %30, %33 : vector<32x128xf32>
    %c2_30 = arith.constant 2 : index
    %c0_31 = arith.constant 0 : index
    %c0_32 = arith.constant 0 : index
    %35 = vector.load %arg6[%c2_30, %c0_31, %c0_32] : memref<10x128x128xbf16, #tpu.memory_space<vmem>>, vector<1x128x128xbf16>
    %36 = vector.shape_cast %35 : vector<1x128x128xbf16> to vector<128x128xbf16>
    %cst_33 = arith.constant dense<0.000000e+00> : vector<32x128xf32>
    %37 = tpu.matmul %15, %36, %cst_33 {dimension_numbers = #tpu.dot_dimension_numbers<[1], [0], [0], [1], [0, 0, 1, 1], [], []>} : vector<32x128xbf16>, vector<128x128xbf16>, vector<32x128xf32> -> vector<32x128xf32>
    %38 = arith.addf %34, %37 : vector<32x128xf32>
    %c3_34 = arith.constant 3 : index
    %c0_35 = arith.constant 0 : index
    %c0_36 = arith.constant 0 : index
    %39 = vector.load %arg6[%c3_34, %c0_35, %c0_36] : memref<10x128x128xbf16, #tpu.memory_space<vmem>>, vector<1x128x128xbf16>
    %40 = vector.shape_cast %39 : vector<1x128x128xbf16> to vector<128x128xbf16>
    %cst_37 = arith.constant dense<0.000000e+00> : vector<32x128xf32>
    %41 = tpu.matmul %19, %40, %cst_37 {dimension_numbers = #tpu.dot_dimension_numbers<[1], [0], [0], [1], [0, 0, 1, 1], [], []>} : vector<32x128xbf16>, vector<128x128xbf16>, vector<32x128xf32> -> vector<32x128xf32>
    %42 = arith.addf %38, %41 : vector<32x128xf32>
    %c4 = arith.constant 4 : index
    %c0_38 = arith.constant 0 : index
    %c0_39 = arith.constant 0 : index
    %43 = vector.load %arg6[%c4, %c0_38, %c0_39] : memref<10x128x128xbf16, #tpu.memory_space<vmem>>, vector<1x128x128xbf16>
    %44 = vector.shape_cast %43 : vector<1x128x128xbf16> to vector<128x128xbf16>
    %cst_40 = arith.constant dense<0.000000e+00> : vector<32x128xf32>
    %45 = tpu.matmul %23, %44, %cst_40 {dimension_numbers = #tpu.dot_dimension_numbers<[1], [0], [0], [1], [0, 0, 1, 1], [], []>} : vector<32x128xbf16>, vector<128x128xbf16>, vector<32x128xf32> -> vector<32x128xf32>
    %46 = arith.addf %42, %45 : vector<32x128xf32>
    %cst_41 = arith.constant 0.000000e+00 : f32
    %47 = vector.broadcast %cst_41 : f32 to vector<32x128xf32>
    %48 = arith.cmpf oge, %46, %47 : vector<32x128xf32>
    %cst_42 = arith.constant 0.00999999977 : f32
    %49 = vector.broadcast %cst_42 : f32 to vector<32x128xf32>
    %50 = arith.mulf %49, %46 : vector<32x128xf32>
    %51 = arith.select %48, %46, %50 : vector<32x128xi1>, vector<32x128xf32>
    %52 = arith.truncf %51 : vector<32x128xf32> to vector<32x128xbf16>
    %c0_43 = arith.constant 0 : index
    %c0_44 = arith.constant 0 : index
    %c0_45 = arith.constant 0 : index
    %53 = vector.load %arg2[%c0_43, %c0_44, %c0_45] : memref<4x32x32xbf16, #tpu.memory_space<vmem>>, vector<1x32x32xbf16>
    %54 = vector.shape_cast %53 : vector<1x32x32xbf16> to vector<32x32xbf16>
    %cst_46 = arith.constant dense<0.000000e+00> : vector<32x128xf32>
    %55 = tpu.matmul %54, %52, %cst_46 {dimension_numbers = #tpu.dot_dimension_numbers<[1], [0], [0], [1], [0, 0, 1, 1], [], []>} : vector<32x32xbf16>, vector<32x128xbf16>, vector<32x128xf32> -> vector<32x128xf32>
    %56 = arith.truncf %55 : vector<32x128xf32> to vector<32x128xbf16>
    %c1_47 = arith.constant 1 : index
    %c0_48 = arith.constant 0 : index
    %c0_49 = arith.constant 0 : index
    %57 = vector.load %arg2[%c1_47, %c0_48, %c0_49] : memref<4x32x32xbf16, #tpu.memory_space<vmem>>, vector<1x32x32xbf16>
    %58 = vector.shape_cast %57 : vector<1x32x32xbf16> to vector<32x32xbf16>
    %cst_50 = arith.constant dense<0.000000e+00> : vector<32x128xf32>
    %59 = tpu.matmul %58, %52, %cst_50 {dimension_numbers = #tpu.dot_dimension_numbers<[1], [0], [0], [1], [0, 0, 1, 1], [], []>} : vector<32x32xbf16>, vector<32x128xbf16>, vector<32x128xf32> -> vector<32x128xf32>
    %60 = arith.truncf %59 : vector<32x128xf32> to vector<32x128xbf16>
    %c2_51 = arith.constant 2 : index
    %c0_52 = arith.constant 0 : index
    %c0_53 = arith.constant 0 : index
    %61 = vector.load %arg2[%c2_51, %c0_52, %c0_53] : memref<4x32x32xbf16, #tpu.memory_space<vmem>>, vector<1x32x32xbf16>
    %62 = vector.shape_cast %61 : vector<1x32x32xbf16> to vector<32x32xbf16>
    %cst_54 = arith.constant dense<0.000000e+00> : vector<32x128xf32>
    %63 = tpu.matmul %62, %52, %cst_54 {dimension_numbers = #tpu.dot_dimension_numbers<[1], [0], [0], [1], [0, 0, 1, 1], [], []>} : vector<32x32xbf16>, vector<32x128xbf16>, vector<32x128xf32> -> vector<32x128xf32>
    %64 = arith.truncf %63 : vector<32x128xf32> to vector<32x128xbf16>
    %c3_55 = arith.constant 3 : index
    %c0_56 = arith.constant 0 : index
    %c0_57 = arith.constant 0 : index
    %65 = vector.load %arg2[%c3_55, %c0_56, %c0_57] : memref<4x32x32xbf16, #tpu.memory_space<vmem>>, vector<1x32x32xbf16>
    %66 = vector.shape_cast %65 : vector<1x32x32xbf16> to vector<32x32xbf16>
    %cst_58 = arith.constant dense<0.000000e+00> : vector<32x128xf32>
    %67 = tpu.matmul %66, %52, %cst_58 {dimension_numbers = #tpu.dot_dimension_numbers<[1], [0], [0], [1], [0, 0, 1, 1], [], []>} : vector<32x32xbf16>, vector<32x128xbf16>, vector<32x128xf32> -> vector<32x128xf32>
    %68 = arith.truncf %67 : vector<32x128xf32> to vector<32x128xbf16>
    %c1_59 = arith.constant 1 : index
    %c0_60 = arith.constant 0 : index
    %c0_61 = arith.constant 0 : index
    %69 = vector.load %arg7[%c1_59, %c0_60, %c0_61] : memref<2x1x128xf32, #tpu.memory_space<vmem>>, vector<1x1x128xf32>
    %70 = vector.shape_cast %69 : vector<1x1x128xf32> to vector<1x128xf32>
    %c5 = arith.constant 5 : index
    %c0_62 = arith.constant 0 : index
    %c0_63 = arith.constant 0 : index
    %71 = vector.load %arg6[%c5, %c0_62, %c0_63] : memref<10x128x128xbf16, #tpu.memory_space<vmem>>, vector<1x128x128xbf16>
    %72 = vector.shape_cast %71 : vector<1x128x128xbf16> to vector<128x128xbf16>
    %cst_64 = arith.constant dense<0.000000e+00> : vector<32x128xf32>
    %73 = tpu.matmul %52, %72, %cst_64 {dimension_numbers = #tpu.dot_dimension_numbers<[1], [0], [0], [1], [0, 0, 1, 1], [], []>} : vector<32x128xbf16>, vector<128x128xbf16>, vector<32x128xf32> -> vector<32x128xf32>
    %74 = vector.broadcast %70 : vector<1x128xf32> to vector<32x128xf32>
    %75 = arith.addf %74, %73 : vector<32x128xf32>
    %c6 = arith.constant 6 : index
    %c0_65 = arith.constant 0 : index
    %c0_66 = arith.constant 0 : index
    %76 = vector.load %arg6[%c6, %c0_65, %c0_66] : memref<10x128x128xbf16, #tpu.memory_space<vmem>>, vector<1x128x128xbf16>
    %77 = vector.shape_cast %76 : vector<1x128x128xbf16> to vector<128x128xbf16>
    %cst_67 = arith.constant dense<0.000000e+00> : vector<32x128xf32>
    %78 = tpu.matmul %56, %77, %cst_67 {dimension_numbers = #tpu.dot_dimension_numbers<[1], [0], [0], [1], [0, 0, 1, 1], [], []>} : vector<32x128xbf16>, vector<128x128xbf16>, vector<32x128xf32> -> vector<32x128xf32>
    %79 = arith.addf %75, %78 : vector<32x128xf32>
    %c7 = arith.constant 7 : index
    %c0_68 = arith.constant 0 : index
    %c0_69 = arith.constant 0 : index
    %80 = vector.load %arg6[%c7, %c0_68, %c0_69] : memref<10x128x128xbf16, #tpu.memory_space<vmem>>, vector<1x128x128xbf16>
    %81 = vector.shape_cast %80 : vector<1x128x128xbf16> to vector<128x128xbf16>
    %cst_70 = arith.constant dense<0.000000e+00> : vector<32x128xf32>
    %82 = tpu.matmul %60, %81, %cst_70 {dimension_numbers = #tpu.dot_dimension_numbers<[1], [0], [0], [1], [0, 0, 1, 1], [], []>} : vector<32x128xbf16>, vector<128x128xbf16>, vector<32x128xf32> -> vector<32x128xf32>
    %83 = arith.addf %79, %82 : vector<32x128xf32>
    %c8 = arith.constant 8 : index
    %c0_71 = arith.constant 0 : index
    %c0_72 = arith.constant 0 : index
    %84 = vector.load %arg6[%c8, %c0_71, %c0_72] : memref<10x128x128xbf16, #tpu.memory_space<vmem>>, vector<1x128x128xbf16>
    %85 = vector.shape_cast %84 : vector<1x128x128xbf16> to vector<128x128xbf16>
    %cst_73 = arith.constant dense<0.000000e+00> : vector<32x128xf32>
    %86 = tpu.matmul %64, %85, %cst_73 {dimension_numbers = #tpu.dot_dimension_numbers<[1], [0], [0], [1], [0, 0, 1, 1], [], []>} : vector<32x128xbf16>, vector<128x128xbf16>, vector<32x128xf32> -> vector<32x128xf32>
    %87 = arith.addf %83, %86 : vector<32x128xf32>
    %c9 = arith.constant 9 : index
    %c0_74 = arith.constant 0 : index
    %c0_75 = arith.constant 0 : index
    %88 = vector.load %arg6[%c9, %c0_74, %c0_75] : memref<10x128x128xbf16, #tpu.memory_space<vmem>>, vector<1x128x128xbf16>
    %89 = vector.shape_cast %88 : vector<1x128x128xbf16> to vector<128x128xbf16>
    %cst_76 = arith.constant dense<0.000000e+00> : vector<32x128xf32>
    %90 = tpu.matmul %68, %89, %cst_76 {dimension_numbers = #tpu.dot_dimension_numbers<[1], [0], [0], [1], [0, 0, 1, 1], [], []>} : vector<32x128xbf16>, vector<128x128xbf16>, vector<32x128xf32> -> vector<32x128xf32>
    %91 = arith.addf %87, %90 : vector<32x128xf32>
    %cst_77 = arith.constant 0.000000e+00 : f32
    %92 = vector.broadcast %cst_77 : f32 to vector<32x128xf32>
    %93 = arith.cmpf oge, %91, %92 : vector<32x128xf32>
    %cst_78 = arith.constant 0.00999999977 : f32
    %94 = vector.broadcast %cst_78 : f32 to vector<32x128xf32>
    %95 = arith.mulf %94, %91 : vector<32x128xf32>
    %96 = arith.select %93, %91, %95 : vector<32x128xi1>, vector<32x128xf32>
    %c0_79 = arith.constant 0 : index
    %c0_80 = arith.constant 0 : index
    %97 = vector.load %arg3[%c0_79, %c0_80] : memref<8x32xbf16, #tpu.memory_space<vmem>>, vector<8x32xbf16>
    %98 = arith.truncf %96 : vector<32x128xf32> to vector<32x128xbf16>
    %cst_81 = arith.constant dense<0.000000e+00> : vector<8x128xf32>
    %99 = tpu.matmul %97, %98, %cst_81 {dimension_numbers = #tpu.dot_dimension_numbers<[1], [0], [0], [1], [0, 0, 1, 1], [], []>} : vector<8x32xbf16>, vector<32x128xbf16>, vector<8x128xf32> -> vector<8x128xf32>
    %100 = arith.truncf %99 : vector<8x128xf32> to vector<8x128xbf16>
    %c0_82 = arith.constant 0 : index
    %c0_83 = arith.constant 0 : index
    %101 = vector.load %arg8[%c0_82, %c0_83] : memref<128x128xbf16, #tpu.memory_space<vmem>>, vector<128x128xbf16>
    %cst_84 = arith.constant dense<0.000000e+00> : vector<8x128xf32>
    %102 = tpu.matmul %100, %101, %cst_84 {dimension_numbers = #tpu.dot_dimension_numbers<[1], [0], [0], [1], [0, 0, 1, 1], [], []>} : vector<8x128xbf16>, vector<128x128xbf16>, vector<8x128xf32> -> vector<8x128xf32>
    %c0_85 = arith.constant 0 : index
    %c0_86 = arith.constant 0 : index
    %103 = vector.load %arg9[%c0_85, %c0_86] : memref<1x128xf32, #tpu.memory_space<vmem>>, vector<1x128xf32>
    %104 = vector.broadcast %103 : vector<1x128xf32> to vector<8x128xf32>
    %105 = arith.addf %102, %104 : vector<8x128xf32>
    %c0_87 = arith.constant 0 : index
    %c0_88 = arith.constant 0 : index
    %c0_89 = arith.constant 0 : index
    %106 = vector.load %arg10[%c0_87, %c0_88, %c0_89] : memref<1x8x128xf32, #tpu.memory_space<vmem>>, vector<1x8x128xf32>
    %107 = vector.shape_cast %106 : vector<1x8x128xf32> to vector<8x128xf32>
    %108 = vector.shape_cast %105 : vector<8x128xf32> to vector<1x8x128xf32>
    tpu.vector_store %arg10[%c0_87, %c0_88, %c0_89], %108 {strides = array<i32>} : memref<1x8x128xf32, #tpu.memory_space<vmem>>, vector<1x8x128xf32>,
    return
  }
  func.func @transform_0(%arg0: i32) -> (i32, i32, i32) {
    %c0_i32 = arith.constant 0 : i32
    %c0_i32_0 = arith.constant 0 : i32
    %c0_i32_1 = arith.constant 0 : i32
    return %arg0, %c0_i32, %c0_i32_0 : i32, i32, i32
  }
  func.func @transform_1(%arg0: i32) -> (i32, i32, i32) {
    %c0_i32 = arith.constant 0 : i32
    %c0_i32_0 = arith.constant 0 : i32
    %c0_i32_1 = arith.constant 0 : i32
    %c0_i32_2 = arith.constant 0 : i32
    return %c0_i32, %c0_i32_0, %c0_i32_1 : i32, i32, i32
  }
  func.func @transform_2(%arg0: i32) -> (i32, i32) {
    %c0_i32 = arith.constant 0 : i32
    %c0_i32_0 = arith.constant 0 : i32
    %c0_i32_1 = arith.constant 0 : i32
    return %c0_i32, %c0_i32_0 : i32, i32
  }
  func.func @transform_3(%arg0: i32) -> (i32, i32) {
    %c0_i32 = arith.constant 0 : i32
    %c0_i32_0 = arith.constant 0 : i32
    %c0_i32_1 = arith.constant 0 : i32
    return %c0_i32, %c0_i32_0 : i32, i32
  }
  func.func @transform_4(%arg0: i32) -> (i32, i32) {
    %c0_i32 = arith.constant 0 : i32
    %c0_i32_0 = arith.constant 0 : i32
    %c0_i32_1 = arith.constant 0 : i32
    return %c0_i32, %c0_i32_0 : i32, i32
  }
  func.func @transform_5(%arg0: i32) -> (i32, i32, i32) {
    %c0_i32 = arith.constant 0 : i32
    %c0_i32_0 = arith.constant 0 : i32
    %c0_i32_1 = arith.constant 0 : i32
    %c0_i32_2 = arith.constant 0 : i32
    return %c0_i32, %c0_i32_0, %c0_i32_1 : i32, i32, i32
  }
  func.func @transform_6(%arg0: i32) -> (i32, i32, i32) {
    %c0_i32 = arith.constant 0 : i32
    %c0_i32_0 = arith.constant 0 : i32
    %c0_i32_1 = arith.constant 0 : i32
    %c0_i32_2 = arith.constant 0 : i32
    return %c0_i32, %c0_i32_0, %c0_i32_1 : i32, i32, i32
  }
  func.func @transform_7(%arg0: i32) -> (i32, i32) {
    %c0_i32 = arith.constant 0 : i32
    %c0_i32_0 = arith.constant 0 : i32
    %c0_i32_1 = arith.constant 0 : i32
    return %c0_i32, %c0_i32_0 : i32, i32
  }
  func.func @transform_8(%arg0: i32) -> (i32, i32) {
    %c0_i32 = arith.constant 0 : i32
    %c0_i32_0 = arith.constant 0 : i32
    %c0_i32_1 = arith.constant 0 : i32
    return %c0_i32, %c0_i32_0 : i32, i32
  }
  func.func @transform_9(%arg0: i32) -> (i32, i32, i32) {
    %c0_i32 = arith.constant 0 : i32
    %c0_i32_0 = arith.constant 0 : i32
    %c0_i32_1 = arith.constant 0 : i32
    return %arg0, %c0_i32, %c0_i32_0 : i32, i32, i32
  }
}

</mosaic_0001>

<bundles_post_ra>
// kernel: gnn_critic_pallas.1
= control target key start
LH: loop header
LB: loop body
LE: loop exit
PB: predicated region body
PF: predicated region fallthrough
CT: control target
= control target key end

     0   :  { %s4008_s0 = inlined_call_operand.hbm [shape: bf16[4,32,128], index: 0, kind: input, shape index: {}]   ;;  %s4009_s1 = inlined_call_operand.hbm [shape: bf16[4,32,32], index: 1, kind: input, shape index: {}]   ;;  %s4010_s2 = inlined_call_operand.hbm [shape: bf16[8,32], index: 2, kind: input, shape index: {}]   ;;  %s4011_s3 = inlined_call_operand.hbm [shape: bf16[128,128], index: 3, kind: input, shape index: {}]   ;;  %s4012_s4 = inlined_call_operand.vmem [shape: f32[1,128], index: 4, kind: input, shape index: {}]   ;;  %s4013_s5 = inlined_call_operand.hbm [shape: bf16[10,128,128], index: 5, kind: input, shape index: {}]   ;;  %s4014_s6 = inlined_call_operand.vmem [shape: f32[2,1,128], index: 6, kind: input, shape index: {}]   ;;  %s4015_s7 = inlined_call_operand.hbm [shape: bf16[128,128], index: 7, kind: input, shape index: {}]   ;;  %s4016_s8 = inlined_call_operand.vmem [shape: f32[1,128], index: 8, kind: input, shape index: {}]   ;;  %s4017_s9 = inlined_call_operand.hbm [shape: f32[4,8,128], index: 9, kind: output, shape index: {}]  }
   0x1   :  { %4024 = sst [smem:[#allocation19_spill]] %s4009_s1 }
   0x2   :  { %4025 = sst [smem:[#allocation20_spill]] %s4010_s2 }
   0x3   :  { %4026 = sst [smem:[#allocation21_spill]] %s4011_s3 }
   0x4   :  { %14 = vsyncpa [#allocation3], 0 }
   0x5   :  { %16 = vsyncpa [#allocation3 + $0x1], 0 }
   0x6   :  { %17 = vsyncpa [#allocation6], 0 }
   0x7   :  { %18 = vsyncpa [#allocation9], 0 }
   0x8   :  { %19 = vsyncpa [#allocation12], 0 }
   0x9   :  { %20 = vsyncpa [#allocation4], 0 }
   0xa   :  { %22 = vsyncpa [#allocation4 + $0x1], 0  ;;  %s3686_s30 = smov 0   ;;  %s3688_s10 = smov 0  }
   0xb   :  { %s3690_s11 = smov 0   ;;  %s3692_s12 = smov 0  }
   0xc LB: > { %s3625_s13 = smov [#allocation5]   ;;  %s3707_s15 = sadd.s32 4294967295, %s3623_s12   ;;  %s3623_s12 = sphi %s3692_s12, %s4052_s12   ;;  %s3619_s11 = sphi %s3690_s11, %s4051_s11   ;;  %s3615_s10 = sphi %s3688_s10, %s4050_s10   ;;  %s3611_s30 = sphi %s3686_s30, %s4049_s30  }
   0xd   : > { %s265_s14 = sshll.u32 %s3625_s13, 4  ;;  %p2565_p0 = scmp.ge.s32.totalorder %s3623_s12, 1  ;;  %s266_s14 = int_to_ptr.vmem [resolvable:$true] %s265_s14 }
   0xe   : > { %p4020_p1 = scmp.eq.s32.totalorder %s3707_s15, 0  ;;  %p253_p2 = scmp.lt.s32.totalorder %s3623_s12, 5 }
   0xf   : > { %s3626_s17 = smov [#allocation8]   ;;  %s3627_s20 = smov [#allocation7]  }
  0x10   : > { %p3712_p3 = pnand %p2565_p0, %p253_p2  ;;  %s289_s18 = sshll.u32 %s3626_s17, 4  ;;  %s3724_s18 = int_to_ptr.vmem [resolvable:$true] %s289_s18 }
  0x11   : > { %s279_s21 = sshll.u32 %s3627_s20, 4  ;;  %s3400_s23 = scalar_lea.vmem %s266_s14, 1024  ;;  %s3726_s21 = int_to_ptr.vmem [resolvable:$true] %s279_s21 }
  0x12   : > { %s4027_s16 = scalar_select %p3712_p3, 1, 0 }
  0x13   : > { %p3206_p4 = pneg %p3712_p3  ;;  %p3401_p7 = scmp.ne.s32.totalorder %s266_s14, %s3400_s23 }
  0x14   : > { %p3408_p10 = scmp.lt.s32.totalorder %s266_s14, %s266_s14  ;;  %p3409_p11 = scmp.lt.s32.totalorder %s3400_s23, %s3400_s23 }
  0x15   : > { %p3720_p5 = pnand %p3206_p4, %p4020_p1 }
  0x16   : > { %p3410_p12 = por %p3409_p11, %p3408_p10 }
  0x17   : > { %p3730_p6 = pneg %p3720_p5 }
  0x19   : > { %p3403_p8 = pnand %p3401_p7, %p3730_p6 }
  0x1b   : > { %p3404_p9 = pneg %p3403_p8 }
  0x1d   : > { %p3411_p13 = pnand %p3410_p12, %p3404_p9 }
  0x1f   : > { %3414 = shalt.err (!%p3411_p13)
}
  0x20   : > { %s4018_s24 = smov 64   ;;  %s4019_s25 = smov 4  }
  0x21   : > { %s4030_s1 = sld [smem:[#allocation19_spill]]  ;;  %s3426_s28 = scalar_lea.vmem %s3724_s18, 1024 }
  0x22   : > { %p3427_p0 = scmp.ne.s32.totalorder %s3724_s18, %s3426_s28  ;;  %p3434_p7 = scmp.lt.s32.totalorder %s3724_s18, %s3724_s18 }
  0x23   : > { %p3435_p8 = scmp.lt.s32.totalorder %s3426_s28, %s3426_s28 }
  0x24   : > { %p3429_p2 = pnand %p3427_p0, %p3730_p6 }
  0x25   : > { %p3436_p9 = por %p3435_p8, %p3434_p7 }
  0x26   : > { %p3430_p4 = pneg %p3429_p2 }
  0x27   : > { %3209 = dma.hbm_to_vmem [thread:$0]  (!%p3720_p5), %s4030_s1, 1024, %s266_s14, [#allocation6], %s4018_s24, %s4018_s24, %s4019_s25  }
  0x28   : > { %p3437_p10 = pnand %p3436_p9, %p3430_p4 }
  0x2a   : > { %3440 = shalt.err (!%p3437_p10)
}
  0x2b   : > { %s4031_s3 = sld [smem:[#allocation21_spill]]  ;;  %s3452_s14 = scalar_lea.vmem %s3726_s21, 64 }
  0x2c   : > { %p3453_p11 = scmp.ne.s32.totalorder %s3726_s21, %s3452_s14  ;;  %p3460_p0 = scmp.lt.s32.totalorder %s3726_s21, %s3726_s21 }
  0x2d   : > { %p3461_p2 = scmp.lt.s32.totalorder %s3452_s14, %s3452_s14 }
  0x2e   : > { %p3455_p12 = pnand %p3453_p11, %p3730_p6 }
  0x2f   : > { %p3462_p4 = por %p3461_p2, %p3460_p0 }
  0x30   : > { %p3456_p13 = pneg %p3455_p12 }
  0x31   : > { %3215 = dma.hbm_to_vmem [thread:$0]  (!%p3720_p5), %s4031_s3, 1024, %s3724_s18, [#allocation9], %s4018_s24, %s4018_s24, %s4019_s25  }
  0x32   : > { %p3463_p7 = pnand %p3462_p4, %p3456_p13 }
  0x34   : > { %3466 = shalt.err (!%p3463_p7)
}
  0x35   : > { %s4032_s2 = sld [smem:[#allocation20_spill]]  ;;  %s3630_s18 = smov [#allocation10]  }
  0x36   : > { %s305_s23 = sshll.u32 %s3630_s18, 4  ;;  %s3631_s26 = smov [#allocation11]   ;;  %s306_s23 = int_to_ptr.vmem [resolvable:$true] %s305_s23 }
  0x37   : > { %s321_s27 = sshll.u32 %s3631_s26, 4  ;;  %s3478_s28 = scalar_lea.vmem %s306_s23, 10240  ;;  %s322_s27 = int_to_ptr.vmem [resolvable:$true] %s321_s27 }
  0x38   : > { %p3479_p8 = scmp.ne.s32.totalorder %s306_s23, %s3478_s28  ;;  %p3486_p11 = scmp.lt.s32.totalorder %s306_s23, %s306_s23 }
  0x39   : > { %p3487_p12 = scmp.lt.s32.totalorder %s3478_s28, %s3478_s28 }
  0x3a   : > { %p3481_p9 = pnand %p3479_p8, %p3730_p6 }
  0x3b   : > { %3212 = dma.hbm_to_vmem [thread:$0]  (!%p3720_p5), %s4032_s2, 64, %s3726_s21, [#allocation6]  }
  0x3c   : > { %p3482_p10 = pneg %p3481_p9  ;;  %p3488_p13 = por %p3487_p12, %p3486_p11 }
  0x3e   : > { %p3489_p0 = pnand %p3488_p13, %p3482_p10 }
  0x40   : > { %3492 = shalt.err (!%p3489_p0)
}
  0x41   : > { %3218 = dma.hbm_to_vmem [thread:$0]  (!%p3720_p5), %s4013_s5, 10240, %s306_s23, [#allocation9], %s4018_s24, %s4018_s24, %s4019_s25  }
  0x42   : > { %s3504_s13 = scalar_lea.vmem %s322_s27, 1024  ;;  %p3512_p8 = scmp.lt.s32.totalorder %s322_s27, %s322_s27 }
  0x43   : > { %p3505_p2 = scmp.ne.s32.totalorder %s322_s27, %s3504_s13  ;;  %p3513_p9 = scmp.lt.s32.totalorder %s3504_s13, %s3504_s13 }
  0x45   : > { %p3507_p4 = pnand %p3505_p2, %p3730_p6  ;;  %p3514_p10 = por %p3513_p9, %p3512_p8 }
  0x47   : > { %p3508_p7 = pneg %p3507_p4 }
  0x49   : > { %p3515_p11 = pnand %p3514_p10, %p3508_p7 }
  0x4b   : > { %3518 = shalt.err (!%p3515_p11)
}
  0x4c   : > { %3221 = dma.hbm_to_vmem [thread:$0]  (!%p3720_p5), %s4015_s7, 1024, %s322_s27, [#allocation12], %s4018_s24, %s4018_s24, %s4019_s25  }
  0x4d   : > { %s2564_s19 = sadd.s32 4294967294, %s3623_s12   ;;  %s3793_s22 = sadd.s32 1, %s3623_s12  }
  0x4e   : > { %s35_s20 = sadd.s32 1, %s3619_s11  ;;  %s32_s18 = ssub.s32 %s3623_s12, %s3793_s22 }
  0x4f   : > { %p42_p6 = scmp.ne.s32.totalorder %s3619_s11, %s3615_s10  ;;  %p33_p12 = scmp.eq.s32.totalorder %s32_s18, 0 }
  0x50   : > { %p43_p13 = scmp.eq.s32.totalorder %s3623_s12, 0  ;;  %p48_p0 = scmp.ne.s32.totalorder %s3615_s10, %s3611_s30 }
  0x51   : > { %p240_p2 = scmp.eq.s32.totalorder %s3707_s15, 3  ;;  %p246_p8 = scmp.eq.s32.totalorder %s2564_s19, 3 }
  0x52   : > { %s3805_s23 = scalar_select %p33_p12, %s3619_s11, %s35_s20  }
  0x53   : > { %p44_p4 = por %p43_p13, %p42_p6  ;;  %p3809_p7 = por %p4020_p1, %p48_p0 }
  0x54   : > { %p3813_p5 = por %p240_p2, %p42_p6  ;;  %p3235_p9 = scmp.lt.s32.totalorder %s3623_s12, 4 }
  0x55   : > { %s4033_s26 = scalar_select %p3809_p7, 1, 0 }
  0x56   : > { %s4034_s27 = scalar_select %p3813_p5, 1, 0 }
  0x57   : > { %s338_s28 = sand.u32 1, %s3619_s11   ;;  %p3819_p10 = por %p246_p8, %p48_p0 }
  0x58   : > { %s2572_s29 = sshll.u32 %s338_s28, 4  ;;  %s2715_s13 = sshll.u32 %s3623_s12, 8 }
  0x59   : > { %s4035_s21 = scalar_select %p3819_p10, 1, 0 }
  0x5a   : > { %s3827_s20 = scalar_lea.hbm %s4008_s0, %s2715_s13  ;;  %s342_s18 = scalar_lea.vmem [#allocation2], %s2572_s29 }
  0x5b   : > { %s349_s24 = sshll.u32 %s342_s18, 4  ;;  %p3829_p11 = pnand %p3235_p9, %p44_p4  ;;  %s3833_s24 = int_to_ptr.vmem [resolvable:$true] %s349_s24 }
  0x5c   : > { %s3835_s25 = scalar_lea.sflag [#allocation3], %s338_s28  ;;  %s3519_s1 = scalar_lea.hbm %s3827_s20, 256 }
  0x5d   : > { %p3520_p6 = scmp.ne.s32.totalorder %s3827_s20, %s3519_s1  ;;  %p3521_p12 = pneg %p3829_p11 }
  0x5e   : > { %s3524_s29 = scalar_lea.hbm %s4008_s0, 1024  ;;  %p3525_p2 = scmp.lt.s32.totalorder %s3827_s20, %s4008_s0 }
  0x5f   : > { %p3522_p13 = pnand %p3521_p12, %p3520_p6  ;;  %p3526_p4 = scmp.lt.s32.totalorder %s3524_s29, %s3519_s1 }
  0x61   : > { %p3523_p0 = pneg %p3522_p13  ;;  %p3527_p8 = por %p3526_p4, %p3525_p2 }
  0x63   : > { %p3528_p9 = pnand %p3527_p8, %p3523_p0 }
  0x65   : > { %3531 = shalt.err (!%p3528_p9)
}
  0x66   : > { %s3532_s28 = scalar_lea.vmem %s3833_s24, 256  ;;  %s3632_s2 = smov [#allocation2]  }
  0x67   : > { %p3533_p1 = scmp.ne.s32.totalorder %s3833_s24, %s3532_s28  ;;  %s3537_s3 = sshll.u32 %s3632_s2, 4  ;;  %s3538_s3 = int_to_ptr.vmem [resolvable:$false] %s3537_s3 }
  0x68   : > { %s3539_s13 = scalar_lea.vmem %s3538_s3, 512  ;;  %p3540_p13 = scmp.lt.s32.totalorder %s3833_s24, %s3538_s3 }
  0x69   : > { %p3535_p10 = pnand %p3533_p1, %p3521_p12  ;;  %p3541_p5 = scmp.lt.s32.totalorder %s3539_s13, %s3532_s28 }
  0x6b   : > { %p3536_p6 = pneg %p3535_p10  ;;  %p3542_p7 = por %p3541_p5, %p3540_p13 }
  0x6d   : > { %p3543_p3 = pnand %p3542_p7, %p3536_p6 }
  0x6f   : > { %3546 = shalt.err (!%p3543_p3)
}
  0x70   : > { %s4037_s1 = smov 4   ;;  %s4038_s14 = smov 64  }
  0x71   : > { %3225 = dma.hbm_to_vmem [thread:$0]  (!%p3829_p11), %s3827_s20, 256, %s3833_s24, %s3835_s25, %s4038_s14, %s4038_s14, %s4037_s1  }
  0x72   : > { %p4039_p1 = scmp.ne.s32.totalorder %s4027_s16, 0 }
  0x73   : > { %s3862_s2 = sand.u32 (!%p4039_p1), 1, %s3615_s10   ;;  %p4040_p3 = scmp.ne.s32.totalorder (!%p4039_p1), %s4033_s26, 0 }
  0x74   : > { %361 = sbr.rel (%p4039_p1) target bundleno = 1685 (0x695), region = 56  ;;  %s2576_s3 = sshll.u32 (!%p4039_p1), %s3862_s2, 4 }
  0x75   : > { %s364_s29 = scalar_lea.sflag (!%p4039_p1), [#allocation3], %s3862_s2  ;;  %s3866_s17 = scalar_lea.vmem (!%p4039_p1), [#allocation2], %s2576_s3 }
  0x79   : > { %3590 = dma.done.wait (%p4040_p3), %s364_s29, 256  }
  0x7a   : > { %3592 = vsyncadd (%p4040_p3), %s364_s29, 4294967040  ;;  %p4041_p7 = scmp.eq.s32.totalorder %s3707_s15, 0 }
  0x7c   : > { %3594 = dma.done.wait (%p4041_p7), [#allocation6], 1088   ;;  %p4042_p5 = pmov %p4041_p7 }
  0x7e   : > { %3596 = vsyncadd (%p4042_p5), [#allocation6], 4294966208  ;;  %p4043_p10 = pmov %p4042_p5 }
  0x7f   : > { %p4044_p11 = pmov %p4042_p5 }
  0x80   : > { %3598 = dma.done.wait (%p4043_p10), [#allocation9], 11264  }
  0x81   : > { %3600 = vsyncadd (%p4044_p11), [#allocation9], 4294956032  ;;  %p4045_p12 = pmov %p4042_p5 }
  0x82   : > { %p4046_p0 = pmov %p4042_p5 }
  0x83   : > { %3602 = dma.done.wait (%p4045_p12), [#allocation12], 1024  }
  0x84   : > { %3604 = vsyncadd (%p4046_p0), [#allocation12], 4294966272  ;;  %v3283_v0 = vld [vmem:[#allocation8 + $0x38] sm:$0xff]   ;;  %v3284_v1 = vld [vmem:[#allocation8 + $0x30] sm:$0xff]   ;;  %vm575_vm0 = vcmask 261120   ;;  %vm3634_vm5 = vmmov 0  }
  0x85   : > { %2870 = vmatprep.subr.bf16.mxu0 %v3283_v0  ;;  %v3285_v2 = vld [vmem:[#allocation8 + $0x28] sm:$0xff]   ;;  %v3286_v3 = vld [vmem:[#allocation8 + $0x20] sm:$0xff]   ;;  %v3287_v5 = vld [vmem:[#allocation8 + $0x18] sm:$0xff]   ;;  %s2582_s18 = sshll.u32 %s3862_s2, 3  ;;  %s2712_s1 = sshll.u32 %s3707_s15, 7 }
  0x86   : > { %2871 = vmatpush3.bf16.msra.mxu0 %v3283_v0  ;;  %v3291_v4 = vld [vmem:[%s3866_s17] sm:$0xff]   ;;  %v3292_v10 = vld [vmem:[%s3866_s17 + $0x8] sm:$0xff]   ;;  %s421_s14 = scalar_lea.vmem [#allocation13], %s2582_s18  ;;  %s3966_s16 = scalar_lea.hbm %s4017_s9, %s2712_s1 }
  0x87   : > { %2872 = vmatprep.subr.bf16.mxu0 %v3284_v1  ;;  %2886 = vmatprep.mubr.bf16.mxu0 %v3291_v4  ;;  %v3288_v6 = vld [vmem:[#allocation8 + $0x10] sm:$0xff]   ;;  %v3289_v7 = vld [vmem:[#allocation8 + $0x8] sm:$0xff]   ;;  %v3290_v8 = vld [vmem:[#allocation8] sm:$0xff]   ;;  %s2446_s3 = sshll.u32 %s421_s14, 4  ;;  %s2433_s24 = scalar_lea.sflag [#allocation4], %s3862_s2  ;;  %s3968_s3 = int_to_ptr.vmem [resolvable:$true] %s2446_s3 }
  0x88   : > { %v3293_v9 = vld [vmem:[#allocation10 + $0x38] sm:$0xff]   ;;  %v3294_v11 = vld [vmem:[#allocation10 + $0x30] sm:$0xff]   ;;  %v3295_v12 = vld [vmem:[#allocation10 + $0x28] sm:$0xff]   ;;  %s3547_s25 = scalar_lea.vmem %s3968_s3, 128  ;;  %p4047_p4 = scmp.ne.s32.totalorder %s4034_s27, 0 }
  0x89   : > { %v3296_v13 = vld [vmem:[#allocation10 + $0x20] sm:$0xff]   ;;  %v3297_v14 = vld [vmem:[#allocation10 + $0x18] sm:$0xff]   ;;  %v3298_v15 = vld [vmem:[#allocation10 + $0x10] sm:$0xff]   ;;  %p3548_p2 = scmp.ne.s32.totalorder %s3968_s3, %s3547_s25  ;;  %s3635_s15 = smov [#allocation13]  }
  0x8a   : > { %2873 = vmatpush3.bf16.msra.mxu0 %v3284_v1  ;;  %v3299_v16 = vld [vmem:[#allocation10 + $0x8] sm:$0xff]   ;;  %v3300_v17 = vld [vmem:[#allocation10] sm:$0xff]   ;;  %v3312_v19 = vld [vmem:[#allocation10 + $0xb8] sm:$0xff]   ;;  %s3551_s26 = sshll.u32 %s3635_s15, 4  ;;  %s3552_s26 = int_to_ptr.vmem [resolvable:$false] %s3551_s26 }
  0x8b   : > { %2874 = vmatprep.subr.bf16.mxu0 %v3285_v2  ;;  %v3886_v18 = vld [vmem:[#allocation5] sm:$0xff]   ;;  %v3314_v31 = vld [vmem:[#allocation10 + $0xb0] sm:$0xff]   ;;  %v3893_v32 = vld [vmem:[#allocation5 + $0x8] sm:$0xff]   ;;  %p3549_p8 = pnand %p3548_p2, %p4047_p4  ;;  %s3553_s20 = scalar_lea.vmem %s3552_s26, 256 }
  0x8c   : > { %2894 = vmatprep.mubr.msk.bf16.mxu1 %vm575_vm0, %v3886_v18  ;;  %v2583_v21 = vld [vmem:[%s4012_s4] ss:$0 sm:$0xff]  ;;  %v3895_v33 = vld [vmem:[#allocation5 + $0x10] sm:$0xff]   ;;  %v3901_v35 = vld [vmem:[#allocation5 + $0x18] sm:$0xff]   ;;  %p3554_p6 = scmp.lt.s32.totalorder %s3968_s3, %s3552_s26  ;;  %p3555_p13 = scmp.lt.s32.totalorder %s3553_s20, %s3547_s25 }
  0x8d   : > { %v3316_v34 = vld [vmem:[#allocation10 + $0xa8] sm:$0xff]   ;;  %v3903_v36 = vld [vmem:[#allocation5 + $0x20] sm:$0xff]   ;;  %v3917_v40 = vld [vmem:[#allocation5 + $0x38] sm:$0xff]   ;;  %p3550_p9 = pneg %p3549_p8 }
  0x8e   : > { %2875 = vmatpush3.bf16.msra.mxu0 %v3285_v2  ;;  %v3909_v37 = vld [vmem:[#allocation5 + $0x28] sm:$0xff]   ;;  %v3911_v38 = vld [vmem:[#allocation5 + $0x30] sm:$0xff]   ;;  %v3309_v39 = vld [vmem:[#allocation10 + $0x78] sm:$0xff]   ;;  %p3556_p1 = por %p3555_p13, %p3554_p6 }
  0x8f   : > { %2876 = vmatprep.subr.bf16.mxu0 %v3286_v3  ;;  %v3310_v41 = vld [vmem:[#allocation10 + $0x70] sm:$0xff]   ;;  %v3311_v42 = vld [vmem:[#allocation10 + $0x68] sm:$0xff]   ;;  %v3313_v43 = vld [vmem:[#allocation10 + $0x60] sm:$0xff]  }
  0x90   : > { %v3315_v44 = vld [vmem:[#allocation10 + $0x58] sm:$0xff]   ;;  %v3317_v45 = vld [vmem:[#allocation10 + $0x50] sm:$0xff]   ;;  %v3318_v46 = vld [vmem:[#allocation10 + $0xa0] sm:$0xff]   ;;  %p3557_p3 = pnand %p3556_p1, %p3550_p9 }
  0x91   : > { %v3319_v47 = vld [vmem:[#allocation10 + $0x48] sm:$0xff]   ;;  %v3320_v48 = vld [vmem:[#allocation10 + $0x98] sm:$0xff]   ;;  %v3321_v49 = vld [vmem:[#allocation10 + $0x40] sm:$0xff]  }
  0x92   : > { %2877 = vmatpush3.bf16.msra.mxu0 %v3286_v3  ;;  %v3322_v50 = vld [vmem:[#allocation10 + $0x90] sm:$0xff]   ;;  %v3323_v51 = vld [vmem:[#allocation10 + $0x88] sm:$0xff]   ;;  %v3324_v52 = vld [vmem:[#allocation10 + $0xf8] sm:$0xff]  }
  0x93   : > { %2878 = vmatprep.subr.bf16.mxu0 %v3287_v5  ;;  %v3325_v53 = vld [vmem:[#allocation10 + $0x80] sm:$0xff]   ;;  %v3328_v54 = vld [vmem:[#allocation10 + $0x138] sm:$0xff]   ;;  %v3326_v62 = vld [vmem:[#allocation10 + $0xf0] sm:$0xff]  }
  0x94   : > { %v3327_v1 = vld [vmem:[#allocation10 + $0xe8] sm:$0xff]  }
  0x96   : > { %2879 = vmatpush3.bf16.msra.mxu0 %v3287_v5  ;;  %v3329_v5 = vld [vmem:[#allocation10 + $0xe0] sm:$0xff]  }
  0x97   : > { %2880 = vmatprep.subr.bf16.mxu0 %v3288_v6 }
  0x9a   : > { %2881 = vmatpush3.bf16.msra.mxu0 %v3288_v6  ;;  %v3330_v6 = vld [vmem:[#allocation10 + $0x130] sm:$0xff]  }
  0x9b   : > { %2882 = vmatprep.subr.bf16.mxu0 %v3289_v7 }
  0x9e   : > { %2883 = vmatpush3.bf16.msra.mxu0 %v3289_v7 }
  0x9f   : > { %2884 = vmatprep.subr.bf16.mxu0 %v3290_v8 }
  0xa2   : > { %2885 = vmatpush3.bf16.msra.mxu0 %v3290_v8 }
  0xa3   : > { %2922 = vmatprep.subr.bf16.mxu0 %v3293_v9 }
  0xa5   : > { %2887 = vmatmul.mubr.bf16.vlgmr.msra.gmra.mxu0 %v3292_v10  ;;  %v3332_v10 = vld [vmem:[#allocation10 + $0x128] sm:$0xff]  }
  0xa6   : > { %2923 = vmatpush3.bf16.msra.mxu0 %v3293_v9  ;;  %v3331_v9 = vld [vmem:[#allocation10 + $0xd8] sm:$0xff]  }
  0xa7   : > { %2924 = vmatprep.subr.bf16.mxu0 %v3294_v11 }
  0xaa   : > { %2925 = vmatpush3.bf16.msra.mxu0 %v3294_v11 }
  0xab   : > { %2926 = vmatprep.subr.bf16.mxu0 %v3295_v12 }
  0xae   : > { %2927 = vmatpush3.bf16.msra.mxu0 %v3295_v12 }
  0xaf   : > { %2928 = vmatprep.subr.bf16.mxu0 %v3296_v13 }
  0xb2   : > { %2929 = vmatpush3.bf16.msra.mxu0 %v3296_v13 }
  0xb3   : > { %2930 = vmatprep.subr.bf16.mxu0 %v3297_v14 }
  0xb6   : > { %2931 = vmatpush3.bf16.msra.mxu0 %v3297_v14  ;;  %v3333_v14 = vld [vmem:[#allocation10 + $0xd0] sm:$0xff]  }
  0xb7   : > { %2932 = vmatprep.subr.bf16.mxu0 %v3298_v15 }
  0xba   : > { %2933 = vmatpush3.bf16.msra.mxu0 %v3298_v15  ;;  %v3334_v15 = vld [vmem:[#allocation10 + $0x120] sm:$0xff]  }
  0xbb   : > { %2934 = vmatprep.subr.bf16.mxu0 %v3299_v16 }
  0xbe   : > { %2935 = vmatpush3.bf16.msra.mxu0 %v3299_v16 }
  0xbf   : > { %2936 = vmatprep.subr.bf16.mxu0 %v3300_v17 }
  0xc2   : > { %2937 = vmatpush3.bf16.msra.mxu0 %v3300_v17 }
  0xc3   : > { %2962 = vmatprep.subr.bf16.mxu0 %v3312_v19 }
 0x165   : > { %v2888_v20 = vpop.f32.mrf.mxu0 }
 0x166   : > { %v553_v24 = vadd.f32 %v2888_v20, %v2583_v21  ;;  %v3336_v20 = vld [vmem:[#allocation10 + $0x118] sm:$0xff]  }
 0x167   : > { %v544_v22 = vpop.f32.mrf.mxu0 }
 0x168   : > { %v545_v27 = vadd.f32 %v2583_v21, %v544_v22 }
 0x169   : > { %v2889_v23 = vpop.f32.mrf.mxu0 }
 0x16a   : > { %v556_v25 = vadd.f32 %v2889_v23, %v2583_v21 }
 0x16b   : > { %v547_v26 = vpop.f32.mrf.mxu0 }
 0x16c   : > { %v560_v28 = vpack.c.bf16 %v556_v25, %v553_v24  ;;  %v548_v29 = vadd.f32 %v2583_v21, %v547_v26  ;;  %v3337_v24 = vld [vmem:[#allocation10 + $0xc0] sm:$0xff]   ;;  %v3338_v25 = vld [vmem:[#allocation10 + $0x110] sm:$0xff]   ;;  %v3339_v26 = vld [vmem:[#allocation10 + $0x108] sm:$0xff]  }
 0x16e   : > { %v559_v30 = vpack.c.bf16 %v548_v29, %v545_v27  ;;  %2890 = vmatprep.subr.bf16.mxu1 %v560_v28 }
 0x16f   : > { %2891 = vmatpush3.bf16.msra.mxu1 %v560_v28 }
 0x170   : > { %2892 = vmatprep.subr.bf16.mxu1 %v559_v30  ;;  %2938 = vmatprep.mubr.bf16.mxu0 %v559_v30 }
 0x171   : > { %2939 = vmatmul.mubr.bf16.vlgmr.msra.gmra.mxu0 %v560_v28 }
 0x172   : > { %2963 = vmatpush3.bf16.msra.mxu0 %v3312_v19  ;;  %v3335_v19 = vld [vmem:[#allocation10 + $0xc8] sm:$0xff]  }
 0x173   : > { %2893 = vmatpush3.bf16.msra.mxu1 %v559_v30  ;;  %2964 = vmatprep.subr.bf16.mxu0 %v3314_v31 }
 0x174   : > { %2898 = vmatprep.subr.bf16.mxu1 %v560_v28 }
 0x176   : > { %2895 = vmatmul.mubr.msk.bf16.vlgmr.msra.gmra.mxu1 %vm575_vm0, %v3893_v32  ;;  %2965 = vmatpush3.bf16.msra.mxu0 %v3314_v31  ;;  %v3342_v31 = vld [vmem:[#allocation10 + $0x170] sm:$0xff]  }
 0x177   : > { %2899 = vmatpush3.bf16.msra.mxu1 %v560_v28  ;;  %2902 = vmatprep.mubr.msk.bf16.mxu1 %vm575_vm0, %v3895_v33 }
 0x178   : > { %2900 = vmatprep.subr.bf16.mxu1 %v559_v30  ;;  %2966 = vmatprep.subr.bf16.mxu0 %v3316_v34 }
 0x17a   : > { %2967 = vmatpush3.bf16.msra.mxu0 %v3316_v34  ;;  %v3343_v34 = vld [vmem:[#allocation10 + $0x168] sm:$0xff]  }
 0x17b   : > { %2901 = vmatpush3.bf16.msra.mxu1 %v559_v30  ;;  %2968 = vmatprep.subr.bf16.mxu0 %v3318_v46 }
 0x17c   : > { %2906 = vmatprep.subr.bf16.mxu1 %v560_v28 }
 0x17e   : > { %2903 = vmatmul.mubr.msk.bf16.vlgmr.msra.gmra.mxu1 %vm575_vm0, %v3901_v35  ;;  %2969 = vmatpush3.bf16.msra.mxu0 %v3318_v46 }
 0x17f   : > { %2907 = vmatpush3.bf16.msra.mxu1 %v560_v28  ;;  %2910 = vmatprep.mubr.msk.bf16.mxu1 %vm575_vm0, %v3903_v36 }
 0x180   : > { %2908 = vmatprep.subr.bf16.mxu1 %v559_v30  ;;  %2970 = vmatprep.subr.bf16.mxu0 %v3320_v48 }
 0x182   : > { %2971 = vmatpush3.bf16.msra.mxu0 %v3320_v48 }
 0x183   : > { %2909 = vmatpush3.bf16.msra.mxu1 %v559_v30  ;;  %2972 = vmatprep.subr.bf16.mxu0 %v3322_v50 }
 0x184   : > { %2914 = vmatprep.subr.bf16.mxu1 %v560_v28 }
 0x186   : > { %2911 = vmatmul.mubr.msk.bf16.vlgmr.msra.gmra.mxu1 %vm575_vm0, %v3909_v37  ;;  %2973 = vmatpush3.bf16.msra.mxu0 %v3322_v50 }
 0x187   : > { %2915 = vmatpush3.bf16.msra.mxu1 %v560_v28  ;;  %2918 = vmatprep.mubr.msk.bf16.mxu1 %vm575_vm0, %v3911_v38  ;;  %v3340_v28 = vld [vmem:[#allocation10 + $0x100] sm:$0xff]  }
 0x188   : > { %2916 = vmatprep.subr.bf16.mxu1 %v559_v30  ;;  %2974 = vmatprep.subr.bf16.mxu0 %v3323_v51 }
 0x18a   : > { %2975 = vmatpush3.bf16.msra.mxu0 %v3323_v51 }
 0x18b   : > { %2917 = vmatpush3.bf16.msra.mxu1 %v559_v30  ;;  %2976 = vmatprep.subr.bf16.mxu0 %v3325_v53  ;;  %v3341_v30 = vld [vmem:[#allocation10 + $0x178] sm:$0xff]  }
 0x18c   : > { %2942 = vmatprep.subr.bf16.mxu1 %v3309_v39 }
 0x18e   : > { %2919 = vmatmul.mubr.msk.bf16.vlgmr.msra.gmra.mxu1 %vm575_vm0, %v3917_v40  ;;  %2977 = vmatpush3.bf16.msra.mxu0 %v3325_v53  ;;  %v2618_v53 = vld [vmem:[%s4014_s6] ss:$0 sm:$0xff] }
 0x18f   : > { %2943 = vmatpush3.bf16.msra.mxu1 %v3309_v39  ;;  %3002 = vmatprep.subr.bf16.mxu0 %v3328_v54  ;;  %v3344_v39 = vld [vmem:[#allocation10 + $0x160] sm:$0xff]  }
 0x190   : > { %2944 = vmatprep.subr.bf16.mxu1 %v3310_v41 }
 0x193   : > { %2945 = vmatpush3.bf16.msra.mxu1 %v3310_v41  ;;  %v3345_v41 = vld [vmem:[#allocation10 + $0x158] sm:$0xff]  }
 0x194   : > { %2946 = vmatprep.subr.bf16.mxu1 %v3311_v42 }
 0x197   : > { %2947 = vmatpush3.bf16.msra.mxu1 %v3311_v42  ;;  %v3347_v42 = vld [vmem:[#allocation10 + $0x148] sm:$0xff]  }
 0x198   : > { %2948 = vmatprep.subr.bf16.mxu1 %v3313_v43 }
 0x19b   : > { %2949 = vmatpush3.bf16.msra.mxu1 %v3313_v43  ;;  %v3348_v43 = vld [vmem:[#allocation10 + $0x140] sm:$0xff]  }
 0x19c   : > { %2950 = vmatprep.subr.bf16.mxu1 %v3315_v44 }
 0x19f   : > { %2951 = vmatpush3.bf16.msra.mxu1 %v3315_v44  ;;  %v3352_v44 = vld [vmem:[#allocation10 + $0x1f8] sm:$0xff]  }
 0x1a0   : > { %2952 = vmatprep.subr.bf16.mxu1 %v3317_v45 }
 0x1a3   : > { %2953 = vmatpush3.bf16.msra.mxu1 %v3317_v45 }
 0x1a4   : > { %2954 = vmatprep.subr.bf16.mxu1 %v3319_v47 }
 0x1a7   : > { %2955 = vmatpush3.bf16.msra.mxu1 %v3319_v47 }
 0x1a8   : > { %2956 = vmatprep.subr.bf16.mxu1 %v3321_v49 }
 0x1ab   : > { %2957 = vmatpush3.bf16.msra.mxu1 %v3321_v49 }
 0x1ac   : > { %2982 = vmatprep.subr.bf16.mxu1 %v3324_v52 }
 0x231   : > { %v2940_v45 = vpop.f32.mrf.mxu0 }
 0x233   : > { %v948_v46 = vpop.f32.mrf.mxu0 }
 0x235   : > { %v2941_v48 = vpop.f32.mrf.mxu0 }
 0x236   : > { %v2896_v55 = vpop.f32.mrf.mxu1 }
 0x237   : > { %v951_v50 = vpop.f32.mrf.mxu0 }
 0x238   : > { %v616_v56 = vpop.f32.mrf.mxu1 }
 0x23a   : > { %v2897_v57 = vpop.f32.mrf.mxu1 }
 0x23b   : > { %v632_v60 = vpack.c.bf16 %v2897_v57, %v2896_v55  ;;  %v971_v57 = vadd.f32 %v2940_v45, %v2618_v53  ;;  %v3363_v45 = vld [vmem:[#allocation10 + $0x1c8] sm:$0xff]  }
 0x23c   : > { %v619_v58 = vpop.f32.mrf.mxu1 }
 0x23d   : > { %v631_v59 = vpack.c.bf16 %v619_v58, %v616_v56 }
 0x23e   : > { %v2904_v61 = vpop.f32.mrf.mxu1 }
 0x23f   : > { %2958 = vmatprep.mubr.bf16.mxu1 %v631_v59 }
 0x240   : > { %v688_v63 = vpop.f32.mrf.mxu1  ;;  %2959 = vmatmul.mubr.bf16.vlgmr.msra.gmra.mxu1 %v632_v60  ;;  %v969_v60 = vadd.f32 %v2618_v53, %v948_v46  ;;  %v3364_v46 = vld [vmem:[#allocation10 + $0x238] sm:$0xff]  }
 0x241   : > { %2983 = vmatpush3.bf16.msra.mxu1 %v3324_v52 }
 0x242   : > { %v2905_v0 = vpop.f32.mrf.mxu1  ;;  %2984 = vmatprep.subr.bf16.mxu1 %v3326_v62 }
 0x243   : > { %v704_v4 = vpack.c.bf16 %v2905_v0, %v2904_v61 }
 0x244   : > { %v691_v2 = vpop.f32.mrf.mxu1 }
 0x245   : > { %v703_v3 = vpack.c.bf16 %v691_v2, %v688_v63  ;;  %2985 = vmatpush3.bf16.msra.mxu1 %v3326_v62  ;;  %v972_v62 = vadd.f32 %v2941_v48, %v2618_v53  ;;  %v3368_v48 = vld [vmem:[#allocation10 + $0x278] sm:$0xff]  }
 0x246   : > { %2986 = vmatprep.subr.bf16.mxu1 %v3327_v1  ;;  %v2912_v7 = vpop.f32.mrf.mxu1 }
 0x247   : > { %2978 = vmatprep.mubr.bf16.mxu0 %v703_v3  ;;  %v970_v3 = vadd.f32 %v2618_v53, %v951_v50 }
 0x248   : > { %2979 = vmatmul.mubr.bf16.vlgmr.msra.gmra.mxu0 %v704_v4  ;;  %v760_v8 = vpop.f32.mrf.mxu1 }
 0x249   : > { %2987 = vmatpush3.bf16.msra.mxu1 %v3327_v1  ;;  %3003 = vmatpush3.bf16.msra.mxu0 %v3328_v54 }
 0x24a   : > { %2988 = vmatprep.subr.bf16.mxu1 %v3329_v5  ;;  %3004 = vmatprep.subr.bf16.mxu0 %v3330_v6  ;;  %v2913_v11 = vpop.f32.mrf.mxu1 }
 0x24b   : > { %v776_v27 = vpack.c.bf16 %v2913_v11, %v2912_v7 }
 0x24c   : > { %v763_v12 = vpop.f32.mrf.mxu1 }
 0x24d   : > { %2989 = vmatpush3.bf16.msra.mxu1 %v3329_v5  ;;  %3005 = vmatpush3.bf16.msra.mxu0 %v3330_v6  ;;  %v775_v13 = vpack.c.bf16 %v763_v12, %v760_v8 }
 0x24e   : > { %2990 = vmatprep.subr.bf16.mxu1 %v3331_v9  ;;  %3006 = vmatprep.subr.bf16.mxu0 %v3332_v10  ;;  %v2920_v16 = vpop.f32.mrf.mxu1 }
 0x24f   : > { %2998 = vmatprep.mubr.bf16.mxu1 %v775_v13 }
 0x250   : > { %v832_v17 = vpop.f32.mrf.mxu1 }
 0x251   : > { %2991 = vmatpush3.bf16.msra.mxu1 %v3331_v9  ;;  %3007 = vmatpush3.bf16.msra.mxu0 %v3332_v10 }
 0x252   : > { %2992 = vmatprep.subr.bf16.mxu1 %v3333_v14  ;;  %3008 = vmatprep.subr.bf16.mxu0 %v3334_v15  ;;  %v2921_v21 = vpop.f32.mrf.mxu1 }
 0x253   : > { %v848_v29 = vpack.c.bf16 %v2921_v21, %v2920_v16 }
 0x254   : > { %v835_v22 = vpop.f32.mrf.mxu1 }
 0x255   : > { %2993 = vmatpush3.bf16.msra.mxu1 %v3333_v14  ;;  %3009 = vmatpush3.bf16.msra.mxu0 %v3334_v15  ;;  %v847_v23 = vpack.c.bf16 %v835_v22, %v832_v17 }
 0x256   : > { %2994 = vmatprep.subr.bf16.mxu1 %v3335_v19  ;;  %3010 = vmatprep.subr.bf16.mxu0 %v3336_v20 }
 0x257   : > { %3018 = vmatprep.mubr.bf16.mxu0 %v847_v23 }
 0x259   : > { %2995 = vmatpush3.bf16.msra.mxu1 %v3335_v19  ;;  %3011 = vmatpush3.bf16.msra.mxu0 %v3336_v20 }
 0x25a   : > { %2996 = vmatprep.subr.bf16.mxu1 %v3337_v24  ;;  %3012 = vmatprep.subr.bf16.mxu0 %v3338_v25 }
 0x25d   : > { %2997 = vmatpush3.bf16.msra.mxu1 %v3337_v24  ;;  %3013 = vmatpush3.bf16.msra.mxu0 %v3338_v25 }
 0x25e   : > { %3014 = vmatprep.subr.bf16.mxu0 %v3339_v26 }
 0x260   : > { %2999 = vmatmul.mubr.bf16.vlgmr.msra.gmra.mxu1 %v776_v27 }
 0x261   : > { %3015 = vmatpush3.bf16.msra.mxu0 %v3339_v26  ;;  %3026 = vmatprep.mubr.msk.bf16.mxu1 %vm575_vm0, %v3886_v18  ;;  %v3346_v18 = vld [vmem:[#allocation10 + $0x150] sm:$0xff]  }
 0x262   : > { %3016 = vmatprep.subr.bf16.mxu0 %v3340_v28 }
 0x265   : > { %3017 = vmatpush3.bf16.msra.mxu0 %v3340_v28 }
 0x266   : > { %3054 = vmatprep.subr.bf16.mxu0 %v3341_v30 }
 0x268   : > { %3019 = vmatmul.mubr.bf16.vlgmr.msra.gmra.mxu0 %v848_v29 }
 0x269   : > { %3055 = vmatpush3.bf16.msra.mxu0 %v3341_v30 }
 0x26a   : > { %3056 = vmatprep.subr.bf16.mxu0 %v3342_v31 }
 0x26d   : > { %3057 = vmatpush3.bf16.msra.mxu0 %v3342_v31 }
 0x26e   : > { %3058 = vmatprep.subr.bf16.mxu0 %v3343_v34 }
 0x271   : > { %3059 = vmatpush3.bf16.msra.mxu0 %v3343_v34 }
 0x272   : > { %3060 = vmatprep.subr.bf16.mxu0 %v3344_v39 }
 0x275   : > { %3061 = vmatpush3.bf16.msra.mxu0 %v3344_v39  ;;  %v3354_v39 = vld [vmem:[#allocation10 + $0x1f0] sm:$0xff]  }
 0x276   : > { %3062 = vmatprep.subr.bf16.mxu0 %v3345_v41 }
 0x279   : > { %3063 = vmatpush3.bf16.msra.mxu0 %v3345_v41  ;;  %v3356_v41 = vld [vmem:[#allocation10 + $0x1e8] sm:$0xff]  }
 0x27a   : > { %3064 = vmatprep.subr.bf16.mxu0 %v3346_v18 }
 0x27d   : > { %3065 = vmatpush3.bf16.msra.mxu0 %v3346_v18  ;;  %v3358_v18 = vld [vmem:[#allocation10 + $0x1e0] sm:$0xff]  }
 0x27e   : > { %3066 = vmatprep.subr.bf16.mxu0 %v3347_v42 }
 0x281   : > { %3067 = vmatpush3.bf16.msra.mxu0 %v3347_v42  ;;  %v3359_v42 = vld [vmem:[#allocation10 + $0x188] sm:$0xff]  }
 0x282   : > { %3068 = vmatprep.subr.bf16.mxu0 %v3348_v43 }
 0x285   : > { %3069 = vmatpush3.bf16.msra.mxu0 %v3348_v43  ;;  %v3361_v43 = vld [vmem:[#allocation10 + $0x180] sm:$0xff]  }
 0x286   : > { %3094 = vmatprep.subr.bf16.mxu0 %v3352_v44 }
 0x300   : > { %v2960_v47 = vpop.f32.mrf.mxu1 }
 0x301   : > { %v1089_v61 = vadd.f32 %v2960_v47, %v971_v57  ;;  %v3365_v47 = vld [vmem:[#allocation10 + $0x1c0] sm:$0xff]  }
 0x302   : > { %v1072_v49 = vpop.f32.mrf.mxu1 }
 0x303   : > { %v1087_v63 = vadd.f32 %v1072_v49, %v969_v60 }
 0x304   : > { %v2961_v51 = vpop.f32.mrf.mxu1 }
 0x305   : > { %v1090_v4 = vadd.f32 %v2961_v51, %v972_v62 }
 0x306   : > { %v1075_v54 = vpop.f32.mrf.mxu1 }
 0x307   : > { %v1088_v8 = vadd.f32 %v1075_v54, %v970_v3  ;;  %v3371_v3 = vld [vmem:[#allocation10 + $0x218] sm:$0xff]  }
 0x308   : > { %v2980_v52 = vpop.f32.mrf.mxu0 }
 0x309   : > { %v1207_v0 = vadd.f32 %v2980_v52, %v1089_v61 }
 0x30a   : > { %v1190_v55 = vpop.f32.mrf.mxu0 }
 0x30b   : > { %v1205_v5 = vadd.f32 %v1190_v55, %v1087_v63  ;;  %v3369_v63 = vld [vmem:[#allocation10 + $0x220] sm:$0xff]  }
 0x30c   : > { %v2981_v58 = vpop.f32.mrf.mxu0 }
 0x30d   : > { %v1208_v9 = vadd.f32 %v2981_v58, %v1090_v4  ;;  %v3372_v4 = vld [vmem:[#allocation10 + $0x268] sm:$0xff]  }
 0x30e   : > { %v1193_v1 = vpop.f32.mrf.mxu0 }
 0x30f   : > { %v1206_v14 = vadd.f32 %v1193_v1, %v1088_v8  ;;  %v3373_v8 = vld [vmem:[#allocation10 + $0x210] sm:$0xff]  }
 0x320   : > { %v3000_v56 = vpop.f32.mrf.mxu1 }
 0x321   : > { %v1325_v6 = vadd.f32 %v3000_v56, %v1207_v0  ;;  %v3366_v56 = vld [vmem:[#allocation10 + $0x230] sm:$0xff]  }
 0x322   : > { %v1308_v59 = vpop.f32.mrf.mxu1  ;;  %v3370_v0 = vld [vmem:[#allocation10 + $0x270] sm:$0xff]  }
 0x323   : > { %v1323_v10 = vadd.f32 %v1308_v59, %v1205_v5  ;;  %v3367_v59 = vld [vmem:[#allocation10 + $0x228] sm:$0xff]  }
 0x324   : > { %v3001_v2 = vpop.f32.mrf.mxu1 }
 0x325   : > { %v1326_v15 = vadd.f32 %v3001_v2, %v1208_v9  ;;  %v3374_v9 = vld [vmem:[#allocation10 + $0x260] sm:$0xff]  }
 0x326   : > { %v1311_v12 = vpop.f32.mrf.mxu1 }
 0x327   : > { %v1324_v19 = vadd.f32 %v1311_v12, %v1206_v14  ;;  %v3375_v12 = vld [vmem:[#allocation10 + $0x208] sm:$0xff]  }
 0x328   : > { %v3020_v7 = vpop.f32.mrf.mxu0 }
 0x329   : > { %v1443_v11 = vadd.f32 %v3020_v7, %v1325_v6 }
 0x32a   : > { %v1426_v13 = vpop.f32.mrf.mxu0 }
 0x32b   : > { %v1441_v16 = vadd.f32 %v1426_v13, %v1323_v10  ;;  %v1451_v20 = vmul.f32 0.01, %v1443_v11  ;;  %vm1447_vm1 = vcmp.ge.f32.partialorder %v1443_v11, 0.0  ;;  %v3376_v13 = vld [vmem:[#allocation10 + $0x258] sm:$0xff]  }
 0x32c   : > { %v3021_v17 = vpop.f32.mrf.mxu0 }
 0x32d   : > { %v1444_v21 = vadd.f32 %v3021_v17, %v1326_v15  ;;  %v1449_v23 = vmul.f32 0.01, %v1441_v16  ;;  %vm1445_vm3 = vcmp.ge.f32.partialorder %v1441_v16, 0.0  ;;  %v1455_v26 = vsel %vm1447_vm1, %v1443_v11, %v1451_v20  ;;  %v3377_v17 = vld [vmem:[#allocation10 + $0x200] sm:$0xff]   ;;  %v3379_v20 = vld [vmem:[#allocation10 + $0x248] sm:$0xff]  }
 0x32e   : > { %v1429_v22 = vpop.f32.mrf.mxu0 }
 0x32f   : > { %vm1448_vm2 = vcmp.ge.f32.partialorder %v1444_v21, 0.0  ;;  %v1452_v24 = vmul.f32 0.01, %v1444_v21  ;;  %v1442_v25 = vadd.f32 %v1429_v22, %v1324_v19  ;;  %v1453_v30 = vsel %vm1445_vm3, %v1441_v16, %v1449_v23  ;;  %v3378_v19 = vld [vmem:[#allocation10 + $0x250] sm:$0xff]   ;;  %v3380_v22 = vld [vmem:[#allocation10 + $0x240] sm:$0xff]  }
 0x331   : > { %v1456_v27 = vsel %vm1448_vm2, %v1444_v21, %v1452_v24  ;;  %vm1446_vm4 = vcmp.ge.f32.partialorder %v1442_v25, 0.0  ;;  %v1450_v28 = vmul.f32 0.01, %v1442_v25  ;;  %v3633_v24 = vmov 0.0  }
 0x332   : > { %v1458_v29 = vpack.c.bf16 %v1456_v27, %v1455_v26 }
 0x333   : > { %v1454_v31 = vsel %vm1446_vm4, %v1442_v25, %v1450_v28 }
 0x334   : > { %v1457_v34 = vpack.c.bf16 %v1454_v31, %v1453_v30  ;;  %3022 = vmatprep.subr.bf16.mxu1 %v1458_v29 }
 0x335   : > { %3023 = vmatpush3.bf16.msra.mxu1 %v1458_v29 }
 0x336   : > { %3024 = vmatprep.subr.bf16.mxu1 %v1457_v34  ;;  %3070 = vmatprep.mubr.bf16.mxu0 %v1457_v34 }
 0x337   : > { %3071 = vmatmul.mubr.bf16.vlgmr.msra.gmra.mxu0 %v1458_v29 }
 0x338   : > { %3095 = vmatpush3.bf16.msra.mxu0 %v3352_v44  ;;  %v3362_v44 = vld [vmem:[#allocation10 + $0x1d0] sm:$0xff]  }
 0x339   : > { %3025 = vmatpush3.bf16.msra.mxu1 %v1457_v34  ;;  %3096 = vmatprep.subr.bf16.mxu0 %v3354_v39 }
 0x33a   : > { %3030 = vmatprep.subr.bf16.mxu1 %v1458_v29 }
 0x33c   : > { %3027 = vmatmul.mubr.msk.bf16.vlgmr.msra.gmra.mxu1 %vm575_vm0, %v3893_v32  ;;  %3097 = vmatpush3.bf16.msra.mxu0 %v3354_v39  ;;  %v3349_v32 = vld [vmem:[#allocation10 + $0x1b8] sm:$0xff]  }
 0x33d   : > { %3031 = vmatpush3.bf16.msra.mxu1 %v1458_v29  ;;  %3034 = vmatprep.mubr.msk.bf16.mxu1 %vm575_vm0, %v3895_v33  ;;  %v3350_v33 = vld [vmem:[#allocation10 + $0x1b0] sm:$0xff]   ;;  %v2668_v39 = vld [vmem:[%s4014_s6 + $0x1] ss:$0 sm:$0xff] }
 0x33e   : > { %3032 = vmatprep.subr.bf16.mxu1 %v1457_v34  ;;  %3098 = vmatprep.subr.bf16.mxu0 %v3356_v41 }
 0x340   : > { %3099 = vmatpush3.bf16.msra.mxu0 %v3356_v41 }
 0x341   : > { %3033 = vmatpush3.bf16.msra.mxu1 %v1457_v34  ;;  %3100 = vmatprep.subr.bf16.mxu0 %v3358_v18 }
 0x342   : > { %3038 = vmatprep.subr.bf16.mxu1 %v1458_v29 }
 0x344   : > { %3035 = vmatmul.mubr.msk.bf16.vlgmr.msra.gmra.mxu1 %vm575_vm0, %v3901_v35  ;;  %v3351_v35 = vld [vmem:[#allocation10 + $0x1a8] sm:$0xff]   ;;  %3101 = vmatpush3.bf16.msra.mxu0 %v3358_v18 }
 0x345   : > { %3039 = vmatpush3.bf16.msra.mxu1 %v1458_v29  ;;  %3042 = vmatprep.mubr.msk.bf16.mxu1 %vm575_vm0, %v3903_v36  ;;  %v3353_v36 = vld [vmem:[#allocation10 + $0x1a0] sm:$0xff]  }
 0x346   : > { %3040 = vmatprep.subr.bf16.mxu1 %v1457_v34 }
 0x349   : > { %3041 = vmatpush3.bf16.msra.mxu1 %v1457_v34 }
 0x34a   : > { %3046 = vmatprep.subr.bf16.mxu1 %v1458_v29 }
 0x34c   : > { %3043 = vmatmul.mubr.msk.bf16.vlgmr.msra.gmra.mxu1 %vm575_vm0, %v3909_v37  ;;  %v3355_v37 = vld [vmem:[#allocation10 + $0x198] sm:$0xff]  }
 0x34d   : > { %3047 = vmatpush3.bf16.msra.mxu1 %v1458_v29  ;;  %3050 = vmatprep.mubr.msk.bf16.mxu1 %vm575_vm0, %v3911_v38  ;;  %v3357_v38 = vld [vmem:[#allocation10 + $0x190] sm:$0xff]  }
 0x34e   : > { %3048 = vmatprep.subr.bf16.mxu1 %v1457_v34 }
 0x351   : > { %3049 = vmatpush3.bf16.msra.mxu1 %v1457_v34 }
 0x352   : > { %3074 = vmatprep.subr.bf16.mxu1 %v3349_v32 }
 0x354   : > { %3051 = vmatmul.mubr.msk.bf16.vlgmr.msra.gmra.mxu1 %vm575_vm0, %v3917_v40  ;;  %v3360_v40 = vld [vmem:[#allocation10 + $0x1d8] sm:$0xff]  }
 0x355   : > { %3075 = vmatpush3.bf16.msra.mxu1 %v3349_v32  ;;  %3102 = vmatprep.subr.bf16.mxu0 %v3360_v40 }
 0x356   : > { %3076 = vmatprep.subr.bf16.mxu1 %v3350_v33  ;;  %3103 = vmatpush3.bf16.msra.mxu0 %v3360_v40 }
 0x357   : > { %3104 = vmatprep.subr.bf16.mxu0 %v3362_v44 }
 0x359   : > { %3077 = vmatpush3.bf16.msra.mxu1 %v3350_v33 }
 0x35a   : > { %3078 = vmatprep.subr.bf16.mxu1 %v3351_v35  ;;  %3105 = vmatpush3.bf16.msra.mxu0 %v3362_v44 }
 0x35b   : > { %3106 = vmatprep.subr.bf16.mxu0 %v3363_v45 }
 0x35d   : > { %3079 = vmatpush3.bf16.msra.mxu1 %v3351_v35 }
 0x35e   : > { %3080 = vmatprep.subr.bf16.mxu1 %v3353_v36  ;;  %3107 = vmatpush3.bf16.msra.mxu0 %v3363_v45 }
 0x35f   : > { %3108 = vmatprep.subr.bf16.mxu0 %v3365_v47 }
 0x361   : > { %3081 = vmatpush3.bf16.msra.mxu1 %v3353_v36 }
 0x362   : > { %3082 = vmatprep.subr.bf16.mxu1 %v3355_v37  ;;  %3109 = vmatpush3.bf16.msra.mxu0 %v3365_v47 }
 0x363   : > { %3134 = vmatprep.subr.bf16.mxu0 %v3368_v48 }
 0x365   : > { %3083 = vmatpush3.bf16.msra.mxu1 %v3355_v37 }
 0x366   : > { %3084 = vmatprep.subr.bf16.mxu1 %v3357_v38 }
 0x369   : > { %3085 = vmatpush3.bf16.msra.mxu1 %v3357_v38 }
 0x36a   : > { %3086 = vmatprep.subr.bf16.mxu1 %v3359_v42 }
 0x36d   : > { %3087 = vmatpush3.bf16.msra.mxu1 %v3359_v42 }
 0x36e   : > { %3088 = vmatprep.subr.bf16.mxu1 %v3361_v43 }
 0x371   : > { %3089 = vmatpush3.bf16.msra.mxu1 %v3361_v43 }
 0x372   : > { %3114 = vmatprep.subr.bf16.mxu1 %v3364_v46 }
 0x3f7   : > { %v3072_v25 = vpop.f32.mrf.mxu0 }
 0x3f8   : > { %v1787_v35 = vadd.f32 %v3072_v25, %v2668_v39 }
 0x3f9   : > { %v1764_v26 = vpop.f32.mrf.mxu0 }
 0x3fa   : > { %v1785_v18 = vadd.f32 %v2668_v39, %v1764_v26 }
 0x3fb   : > { %v3073_v28 = vpop.f32.mrf.mxu0 }
 0x3fc   : > { %v3028_v49 = vpop.f32.mrf.mxu1  ;;  %v1788_v42 = vadd.f32 %v3073_v28, %v2668_v39 }
 0x3fd   : > { %v1767_v30 = vpop.f32.mrf.mxu0 }
 0x3fe   : > { %v1493_v50 = vpop.f32.mrf.mxu1  ;;  %v1786_v45 = vadd.f32 %v2668_v39, %v1767_v30 }
 0x400   : > { %v3029_v51 = vpop.f32.mrf.mxu1 }
 0x401   : > { %v1509_v54 = vpack.c.bf16 %v3029_v51, %v3028_v49 }
 0x402   : > { %v1496_v52 = vpop.f32.mrf.mxu1 }
 0x403   : > { %v1508_v53 = vpack.c.bf16 %v1496_v52, %v1493_v50 }
 0x404   : > { %v3036_v55 = vpop.f32.mrf.mxu1 }
 0x405   : > { %3090 = vmatprep.mubr.bf16.mxu1 %v1508_v53 }
 0x406   : > { %v1544_v57 = vpop.f32.mrf.mxu1  ;;  %3091 = vmatmul.mubr.bf16.vlgmr.msra.gmra.mxu1 %v1509_v54 }
 0x407   : > { %3115 = vmatpush3.bf16.msra.mxu1 %v3364_v46 }
 0x408   : > { %v3037_v58 = vpop.f32.mrf.mxu1  ;;  %3116 = vmatprep.subr.bf16.mxu1 %v3366_v56 }
 0x409   : > { %v1560_v62 = vpack.c.bf16 %v3037_v58, %v3036_v55 }
 0x40a   : > { %v1547_v60 = vpop.f32.mrf.mxu1 }
 0x40b   : > { %v1559_v61 = vpack.c.bf16 %v1547_v60, %v1544_v57  ;;  %3117 = vmatpush3.bf16.msra.mxu1 %v3366_v56 }
 0x40c   : > { %3118 = vmatprep.subr.bf16.mxu1 %v3367_v59  ;;  %v3044_v1 = vpop.f32.mrf.mxu1 }
 0x40d   : > { %3110 = vmatprep.mubr.bf16.mxu0 %v1559_v61 }
 0x40e   : > { %3111 = vmatmul.mubr.bf16.vlgmr.msra.gmra.mxu0 %v1560_v62  ;;  %v1595_v2 = vpop.f32.mrf.mxu1 }
 0x40f   : > { %3119 = vmatpush3.bf16.msra.mxu1 %v3367_v59  ;;  %3135 = vmatpush3.bf16.msra.mxu0 %v3368_v48 }
 0x410   : > { %3120 = vmatprep.subr.bf16.mxu1 %v3369_v63  ;;  %3136 = vmatprep.subr.bf16.mxu0 %v3370_v0  ;;  %v3045_v5 = vpop.f32.mrf.mxu1 }
 0x411   : > { %v1611_v21 = vpack.c.bf16 %v3045_v5, %v3044_v1 }
 0x412   : > { %v1598_v6 = vpop.f32.mrf.mxu1 }
 0x413   : > { %3121 = vmatpush3.bf16.msra.mxu1 %v3369_v63  ;;  %3137 = vmatpush3.bf16.msra.mxu0 %v3370_v0  ;;  %v1610_v7 = vpack.c.bf16 %v1598_v6, %v1595_v2 }
 0x414   : > { %3122 = vmatprep.subr.bf16.mxu1 %v3371_v3  ;;  %3138 = vmatprep.subr.bf16.mxu0 %v3372_v4  ;;  %v3052_v10 = vpop.f32.mrf.mxu1 }
 0x415   : > { %3130 = vmatprep.mubr.bf16.mxu1 %v1610_v7 }
 0x416   : > { %v1646_v11 = vpop.f32.mrf.mxu1 }
 0x417   : > { %3123 = vmatpush3.bf16.msra.mxu1 %v3371_v3  ;;  %3139 = vmatpush3.bf16.msra.mxu0 %v3372_v4 }
 0x418   : > { %3124 = vmatprep.subr.bf16.mxu1 %v3373_v8  ;;  %3140 = vmatprep.subr.bf16.mxu0 %v3374_v9  ;;  %v3053_v14 = vpop.f32.mrf.mxu1 }
 0x419   : > { %v1662_v23 = vpack.c.bf16 %v3053_v14, %v3052_v10  ;;  %v3383_v14 = vld [vmem:[#allocation11 + $0x28] sm:$0xff]  }
 0x41a   : > { %v1649_v15 = vpop.f32.mrf.mxu1 }
 0x41b   : > { %3125 = vmatpush3.bf16.msra.mxu1 %v3373_v8  ;;  %3141 = vmatpush3.bf16.msra.mxu0 %v3374_v9  ;;  %v1661_v16 = vpack.c.bf16 %v1649_v15, %v1646_v11  ;;  %v2273_v11 = vld [vmem:[#allocation7] sm:$0xf]  ;;  %v3384_v15 = vld [vmem:[#allocation11 + $0x20] sm:$0xff]  }
 0x41c   : > { %3126 = vmatprep.subr.bf16.mxu1 %v3375_v12  ;;  %3142 = vmatprep.subr.bf16.mxu0 %v3376_v13 }
 0x41d   : > { %3150 = vmatprep.mubr.bf16.mxu0 %v1661_v16  ;;  %v3385_v16 = vld [vmem:[#allocation11 + $0x18] sm:$0xff]  }
 0x41f   : > { %3127 = vmatpush3.bf16.msra.mxu1 %v3375_v12  ;;  %3143 = vmatpush3.bf16.msra.mxu0 %v3376_v13  ;;  %v3381_v12 = vld [vmem:[#allocation11 + $0x38] sm:$0xff]   ;;  %v3382_v13 = vld [vmem:[#allocation11 + $0x30] sm:$0xff]  }
 0x420   : > { %3128 = vmatprep.subr.bf16.mxu1 %v3377_v17  ;;  %3144 = vmatprep.subr.bf16.mxu0 %v3378_v19 }
 0x423   : > { %3129 = vmatpush3.bf16.msra.mxu1 %v3377_v17  ;;  %3145 = vmatpush3.bf16.msra.mxu0 %v3378_v19  ;;  %v3386_v17 = vld [vmem:[#allocation11 + $0x10] sm:$0xff]   ;;  %v3387_v19 = vld [vmem:[#allocation11 + $0x8] sm:$0xff]  }
 0x424   : > { %3146 = vmatprep.subr.bf16.mxu0 %v3379_v20  ;;  %3154 = vmatprep.subr.bf16.mxu1 %v3633_v24 }
 0x426   : > { %3131 = vmatmul.mubr.bf16.vlgmr.msra.gmra.mxu1 %v1611_v21 }
 0x427   : > { %3147 = vmatpush3.bf16.msra.mxu0 %v3379_v20  ;;  %3158 = vmatprep.mubr.msk.bf16.mxu1 %vm3634_vm5, %v3633_v24  ;;  %v3388_v20 = vld [vmem:[#allocation11] sm:$0xff]  }
 0x428   : > { %3148 = vmatprep.subr.bf16.mxu0 %v3380_v22 }
 0x42b   : > { %3149 = vmatpush3.bf16.msra.mxu0 %v3380_v22 }
 0x42e   : > { %3151 = vmatmul.mubr.bf16.vlgmr.msra.gmra.mxu0 %v1662_v23 }
 0x4c6   : > { %v3092_v27 = vpop.f32.mrf.mxu1 }
 0x4c7   : > { %v1905_v38 = vadd.f32 %v3092_v27, %v1787_v35  ;;  %v2702_v27 = vld [vmem:[%s4016_s8] ss:$0 sm:$0xff] }
 0x4c8   : > { %v1888_v29 = vpop.f32.mrf.mxu1 }
 0x4c9   : > { %v1903_v46 = vadd.f32 %v1888_v29, %v1785_v18 }
 0x4ca   : > { %v3093_v31 = vpop.f32.mrf.mxu1 }
 0x4cb   : > { %v1906_v47 = vadd.f32 %v3093_v31, %v1788_v42 }
 0x4cc   : > { %v1891_v41 = vpop.f32.mrf.mxu1 }
 0x4cd   : > { %v1904_v50 = vadd.f32 %v1891_v41, %v1786_v45 }
 0x4ce   : > { %v3112_v34 = vpop.f32.mrf.mxu0 }
 0x4cf   : > { %v2023_v40 = vadd.f32 %v3112_v34, %v1905_v38 }
 0x4d0   : > { %v2006_v32 = vpop.f32.mrf.mxu0 }
 0x4d1   : > { %v2021_v51 = vadd.f32 %v2006_v32, %v1903_v46 }
 0x4d2   : > { %v3113_v36 = vpop.f32.mrf.mxu0 }
 0x4d3   : > { %v2024_v52 = vadd.f32 %v3113_v36, %v1906_v47 }
 0x4d4   : > { %v2009_v43 = vpop.f32.mrf.mxu0 }
 0x4d5   : > { %v2022_v56 = vadd.f32 %v2009_v43, %v1904_v50 }
 0x4e6   : > { %v3132_v33 = vpop.f32.mrf.mxu1 }
 0x4e7   : > { %v2141_v48 = vadd.f32 %v3132_v33, %v2023_v40 }
 0x4e8   : > { %v2124_v37 = vpop.f32.mrf.mxu1 }
 0x4e9   : > { %v2139_v57 = vadd.f32 %v2124_v37, %v2021_v51 }
 0x4ea   : > { %v3133_v44 = vpop.f32.mrf.mxu1 }
 0x4eb   : > { %v2142_v58 = vadd.f32 %v3133_v44, %v2024_v52 }
 0x4ec   : > { %v2127_v54 = vpop.f32.mrf.mxu1 }
 0x4ed   : > { %v2140_v61 = vadd.f32 %v2127_v54, %v2022_v56 }
 0x4ee   : > { %v3152_v49 = vpop.f32.mrf.mxu0 }
 0x4ef   : > { %v2259_v53 = vadd.f32 %v3152_v49, %v2141_v48 }
 0x4f0   : > { %v2242_v55 = vpop.f32.mrf.mxu0 }
 0x4f1   : > { %v2267_v59 = vmul.f32 0.01, %v2259_v53  ;;  %vm2263_vm6 = vcmp.ge.f32.partialorder %v2259_v53, 0.0  ;;  %v2257_v62 = vadd.f32 %v2242_v55, %v2139_v57 }
 0x4f2   : > { %v3153_v60 = vpop.f32.mrf.mxu0 }
 0x4f3   : > { %v2260_v63 = vadd.f32 %v3153_v60, %v2142_v58  ;;  %v2271_v3 = vsel %vm2263_vm6, %v2259_v53, %v2267_v59  ;;  %v2265_v4 = vmul.f32 0.01, %v2257_v62  ;;  %vm2261_vm9 = vcmp.ge.f32.partialorder %v2257_v62, 0.0 }
 0x4f4   : > { %v2245_v0 = vpop.f32.mrf.mxu0 }
 0x4f5   : > { %vm2264_vm7 = vcmp.ge.f32.partialorder %v2260_v63, 0.0  ;;  %v2268_v1 = vmul.f32 0.01, %v2260_v63  ;;  %v2258_v2 = vadd.f32 %v2245_v0, %v2140_v61  ;;  %v2269_v9 = vsel %vm2261_vm9, %v2257_v62, %v2265_v4 }
 0x4f7   : > { %v2272_v5 = vsel %vm2264_vm7, %v2260_v63, %v2268_v1  ;;  %vm2262_vm8 = vcmp.ge.f32.partialorder %v2258_v2, 0.0  ;;  %v2266_v6 = vmul.f32 0.01, %v2258_v2 }
 0x4f8   : > { %v2275_v7 = vpack.c.bf16 %v2272_v5, %v2271_v3 }
 0x4f9   : > { %v2270_v8 = vsel %vm2262_vm8, %v2258_v2, %v2266_v6 }
 0x4fa   : > { %3155 = vmatpush3.bf16.msra.mxu1 %v2275_v7  ;;  %v2274_v10 = vpack.c.bf16 %v2270_v8, %v2269_v9 }
 0x4fb   : > { %3156 = vmatprep.subr.bf16.mxu1 %v3633_v24 }
 0x4fe   : > { %3157 = vmatpush3.bf16.msra.mxu1 %v2274_v10 }
 0x4ff   : > { %3162 = vmatprep.subr.bf16.mxu1 %v3633_v24 }
 0x501   : > { %3159 = vmatmul.mubr.msk.bf16.vlgmr.msra.gmra.mxu1 %vm575_vm0, %v2273_v11 }
 0x502   : > { %3163 = vmatpush3.bf16.msra.mxu1 %v3381_v12  ;;  %3178 = vmatprep.mubr.msk.bf16.mxu1 %vm3634_vm5, %v3633_v24 }
 0x503   : > { %3164 = vmatprep.subr.bf16.mxu1 %v3633_v24 }
 0x506   : > { %3165 = vmatpush3.bf16.msra.mxu1 %v3382_v13 }
 0x507   : > { %3166 = vmatprep.subr.bf16.mxu1 %v3633_v24 }
 0x50a   : > { %3167 = vmatpush3.bf16.msra.mxu1 %v3383_v14 }
 0x50b   : > { %3168 = vmatprep.subr.bf16.mxu1 %v3633_v24 }
 0x50e   : > { %3169 = vmatpush3.bf16.msra.mxu1 %v3384_v15 }
 0x50f   : > { %3170 = vmatprep.subr.bf16.mxu1 %v3633_v24 }
 0x512   : > { %3171 = vmatpush3.bf16.msra.mxu1 %v3385_v16 }
 0x513   : > { %3172 = vmatprep.subr.bf16.mxu1 %v3633_v24 }
 0x516   : > { %3173 = vmatpush3.bf16.msra.mxu1 %v3386_v17 }
 0x517   : > { %3174 = vmatprep.subr.bf16.mxu1 %v3633_v24 }
 0x51a   : > { %3175 = vmatpush3.bf16.msra.mxu1 %v3387_v19 }
 0x51b   : > { %3176 = vmatprep.subr.bf16.mxu1 %v3633_v24 }
 0x51e   : > { %3177 = vmatpush3.bf16.msra.mxu1 %v3388_v20 }
 0x5c1   : > { %v2313_v21 = vpop.f32.mrf.mxu1 }
 0x5c2   : > { %v2319_v22 = vpack.c.bf16 %v2313_v21, %v2313_v21 }
 0x5c3   : > { %v3160_v23 = vpop.f32.mrf.mxu1 }
 0x5c4   : > { %3179 = vmatmul.mubr.bf16.vlgmr.msra.gmra.mxu1 %v2319_v22 }
 0x5c5   : > { %v2316_v25 = vpop.f32.mrf.mxu1 }
 0x5c7   : > { %v3161_v26 = vpop.f32.mrf.mxu1 }
 0x684   : > { %v2425_v28 = vpop.f32.mrf.mxu1 }
 0x685   : > { %v2426_v24 = vadd.f32 %v2702_v27, %v2425_v28 }
 0x686   : > { %v3180_v29 = vpop.f32.mrf.mxu1 }
 0x687   : > { %2431 = vst [vmem:[%s421_s14] sm:$0xff] %v2426_v24 }
 0x688   : > { %v2428_v30 = vpop.f32.mrf.mxu1 }
 0x689   : > { %3560 = shalt.err (!%p3557_p3)
}
 0x68a   : > { %s3561_s19 = scalar_lea.hbm %s3966_s16, 128  ;;  %s3565_s28 = scalar_lea.hbm %s4017_s9, 512 }
 0x68b   : > { %p3562_p7 = scmp.ne.s32.totalorder %s3966_s16, %s3561_s19  ;;  %p3566_p11 = scmp.lt.s32.totalorder %s3966_s16, %s4017_s9 }
 0x68c   : > { %p3567_p12 = scmp.lt.s32.totalorder %s3565_s28, %s3561_s19 }
 0x68d   : > { %p3563_p5 = pnand %p3562_p7, %p4047_p4 }
 0x68e   : > { %p3568_p0 = por %p3567_p12, %p3566_p11 }
 0x68f   : > { %p3564_p10 = pneg %p3563_p5 }
 0x691   : > { %p3569_p2 = pnand %p3568_p0, %p3564_p10 }
 0x693   : > { %3572 = shalt.err (!%p3569_p2)
}
 0x694   : > { %3204 = dma.vmem_to_hbm [thread:$0]  (%p4047_p4), %s3968_s3, 128, %s3966_s16, %s2433_s24   ;;  %v3181_v31 = vpop.f32.mrf.mxu1 }
 0x695 PF: > { %p3241_p8 = scmp.ge.s32.totalorder %s3623_s12, 2  ;;  %s2458_s14 = sand.u32 1, %s3611_s30  }
 0x696   : > { %p4048_p9 = scmp.ne.s32.totalorder %s4035_s21, 0  ;;  %s2459_s29 = scalar_lea.sflag [#allocation4], %s2458_s14 }
 0x698   : > { %p3227_p6 = pnand %p3241_p8, %p4048_p9 }
 0x69a   : > { %p3228_p13 = pneg %p3227_p6 }
 0x69c   : > { %3606 = dma.done.wait (%p3228_p13), %s2459_s29, 128  }
 0x69d   : > { %3608 = vsyncadd (%p3228_p13), %s2459_s29, 4294967168  ;;  %p25_p1 = scmp.ge.s32.totalorder %s3793_s22, 6   ;;  %s4049_s30 = smov %s3615_s10 }
 0x69e   : > { %s4050_s10 = smov %s3619_s11  ;;  %s4051_s11 = smov %s3805_s23 }
 0x69f   : > { %s4052_s12 = smov %s3793_s22  ;;  %27 = sbr.rel (!%p25_p1) target bundleno = 12 (0xc), region = 134 }
 0x6a4   :  { %2464 = vsyncpa [#allocation3], 1 }
 0x6a5   :  { %2466 = vsyncpa [#allocation3 + $0x1], 1 }
 0x6a6   :  { %2467 = vsyncpa [#allocation6], 1 }
 0x6a7   :  { %2468 = vsyncpa [#allocation9], 1 }
 0x6a8   :  { %2469 = vsyncpa [#allocation12], 1 }
 0x6a9   :  { %2470 = vsyncpa [#allocation4], 1 }
 0x6aa   :  { %2472 = vsyncpa [#allocation4 + $0x1], 1 }

</bundles_post_ra>
